<compile_context>
chip_gen: v7x
topology: tpu7x:2x2x1
jax: 0.10.0
libtpu: 0.0.40
codegen_flags: <defaults>
</compile_context>

<pallas_src>
import jax
import jax.numpy as jnp
from jax.experimental import pallas as pl
from jax.experimental.pallas import tpu as pltpu


def _round_up(x, m):
    return (x + m - 1) // m * m


def _choose_tiles(n):
    """Return (n_pad, tm, tk) with n_pad a multiple of 128 divisible by both tiles."""
    n_pad = _round_up(max(n, 1), 128)

    def pick(cands):
        for t in cands:
            if n_pad % t == 0:
                return t
        return 128

    tk = pick((512, 384, 256, 128))   # adjacency column (reduction) tile
    tm = pick((256, 128))             # adjacency row tile
    return n_pad, tm, tk


# ------------ pass 1: h1 = relu((adj @ (x @ W1)) * inv_deg + b1) -----------------
def _gc1_kernel(x_ref, adj_ref, invdeg_ref, b1_ref, w1_ref, h1_ref, acc_ref):
    k = pl.program_id(1)

    @pl.when(k == 0)
    def _():
        acc_ref[...] = jnp.zeros_like(acc_ref)

    # small (tk,F)@(F,H) matmul stays fused with the adjacency pass
    xw = jnp.dot(x_ref[...], w1_ref[...], preferred_element_type=jnp.float32)
    acc_ref[...] += jnp.dot(adj_ref[...], xw.astype(jnp.bfloat16),
                            preferred_element_type=jnp.float32)

    @pl.when(k == pl.num_programs(1) - 1)
    def _():
        # normalization / bias / relu hoisted out of the reduction loop
        h = acc_ref[...] * invdeg_ref[...] + b1_ref[...]
        h1_ref[...] = jnp.maximum(h, 0.0)


# ------------ pass 2: gc2 + fused mean pooling + Linear + log_softmax ------------
def _gc2_pool_mlp_kernel(h1_ref, adj_ref, invdeg_ref, b2_ref, w2_ref,
                         pool_ref, wm_ref, bm_ref, out_ref,
                         acc_ref, g_acc_ref):
    i = pl.program_id(0)
    k = pl.program_id(1)
    ni = pl.num_programs(0)
    nk = pl.num_programs(1)

    @pl.when((i == 0) & (k == 0))
    def _():
        g_acc_ref[...] = jnp.zeros_like(g_acc_ref)

    @pl.when(k == 0)
    def _():
        acc_ref[...] = jnp.zeros_like(acc_ref)

    hw = jnp.dot(h1_ref[...], w2_ref[...], preferred_element_type=jnp.float32)
    acc_ref[...] += jnp.dot(adj_ref[...], hw.astype(jnp.bfloat16),
                            preferred_element_type=jnp.float32)

    @pl.when(k == nk - 1)
    def _():
        # finalize this row tile of gc2 and fold it straight into the pooled graph repr
        h2 = acc_ref[...] * invdeg_ref[...] + b2_ref[...]          # (tm, H)
        g_acc_ref[...] += jnp.dot(pool_ref[...], h2,
                                  preferred_element_type=jnp.float32)  # (G, H)

    @pl.when((i == ni - 1) & (k == nk - 1))
    def _():
        # mlp + log_softmax over the 128-padded class dim (padded logits ~ -1e30 -> exp=0)
        logits = jnp.dot(g_acc_ref[...], wm_ref[...],
                         preferred_element_type=jnp.float32) + bm_ref[...]
        m = jnp.max(logits, axis=1, keepdims=True)
        z = logits - m
        lse = jnp.log(jnp.sum(jnp.exp(z), axis=1, keepdims=True))
        out_ref[...] = z - lse


@jax.jit
def gcn_forward(node_feat, adj, inv_degs, w1, b1, w2, b2, pool, wm, bm):
    n, f = node_feat.shape
    h = w1.shape[1]
    c = wm.shape[1]
    g = pool.shape[0]
    c_pad = 128
    n_pad, tm, tk = _choose_tiles(n)
    grid = (n_pad // tm, n_pad // tk)

    # --- padding: zero adj/pool rows+cols, inv_deg = 1 for pad rows (no inf*0 NaNs) ---
    x_p = jnp.zeros((n_pad, f), jnp.float32).at[:n, :].set(node_feat.astype(jnp.float32))
    adj_p = jnp.zeros((n_pad, n_pad), jnp.bfloat16).at[:n, :n].set(adj.astype(jnp.bfloat16))
    inv_p = jnp.ones((n_pad, 1), jnp.float32).at[:n, :].set(inv_degs.astype(jnp.float32))
    pool_p = jnp.zeros((g, n_pad), jnp.float32).at[:, :n].set(pool.astype(jnp.float32))
    # class-padded mlp weights: padded columns get a huge negative bias so they vanish
    # from the 128-lane log_softmax.
    wm_p = jnp.zeros((h, c_pad), jnp.float32).at[:, :c].set(wm.astype(jnp.float32))
    bm_p = jnp.full((1, c_pad), -1e30, jnp.float32).at[:, :c].set(bm.astype(jnp.float32))

    adj_bytes = n_pad * n_pad * 2  # bf16

    cost1 = pl.CostEstimate(
        flops=2 * n_pad * n_pad * h + 2 * grid[0] * n_pad * f * h,
        transcendentals=0,
        bytes_accessed=adj_bytes + n_pad * (f + h) * 4)

    h1 = pl.pallas_call(
        _gc1_kernel,
        out_shape=jax.ShapeDtypeStruct((n_pad, h), jnp.float32),
        grid_spec=pltpu.PrefetchScalarGridSpec(
            num_scalar_prefetch=0,
            grid=grid,
            in_specs=[
                pl.BlockSpec((tk, f), lambda i, k: (k, 0)),     # x (column-node block)
                pl.BlockSpec((tm, tk), lambda i, k: (i, k)),    # adj tile
                pl.BlockSpec((tm, 1), lambda i, k: (i, 0)),     # 1/deg (row block)
                pl.BlockSpec((1, h), lambda i, k: (0, 0)),      # b1
                pl.BlockSpec((f, h), lambda i, k: (0, 0)),      # W1
            ],
            out_specs=pl.BlockSpec((tm, h), lambda i, k: (i, 0)),
            scratch_shapes=[pltpu.VMEM((tm, h), jnp.float32)]),
        compiler_params=pltpu.CompilerParams(
            dimension_semantics=("parallel", "arbitrary"),
            vmem_limit_bytes=32 * 1024 * 1024),
        cost_estimate=cost1,
    )(x_p, adj_p, inv_p, b1.astype(jnp.float32), w1.astype(jnp.float32))

    cost2 = pl.CostEstimate(
        flops=(2 * n_pad * n_pad * h + 2 * grid[0] * n_pad * h * h
               + 2 * g * n_pad * h + 2 * g * h * c_pad),
        transcendentals=g * c_pad,
        bytes_accessed=adj_bytes + n_pad * h * 4)

    out_p = pl.pallas_call(
        _gc2_pool_mlp_kernel,
        out_shape=jax.ShapeDtypeStruct((g, c_pad), jnp.float32),
        grid_spec=pltpu.PrefetchScalarGridSpec(
            num_scalar_prefetch=0,
            grid=grid,
            in_specs=[
                pl.BlockSpec((tk, h), lambda i, k: (k, 0)),     # h1 (column-node block)
                pl.BlockSpec((tm, tk), lambda i, k: (i, k)),    # adj tile
                pl.BlockSpec((tm, 1), lambda i, k: (i, 0)),     # 1/deg (row block)
                pl.BlockSpec((1, h), lambda i, k: (0, 0)),      # b2
                pl.BlockSpec((h, h), lambda i, k: (0, 0)),      # W2
                pl.BlockSpec((g, tm), lambda i, k: (0, i)),     # pool (row block)
                pl.BlockSpec((h, c_pad), lambda i, k: (0, 0)),  # Wm (class-padded)
                pl.BlockSpec((1, c_pad), lambda i, k: (0, 0)),  # bm (class-padded)
            ],
            out_specs=pl.BlockSpec((g, c_pad), lambda i, k: (0, 0)),
            scratch_shapes=[pltpu.VMEM((tm, h), jnp.float32),   # gc2 row-tile accumulator
                            pltpu.VMEM((g, h), jnp.float32)]),  # pooled graph accumulator
        compiler_params=pltpu.CompilerParams(
            # pooling accumulates across row tiles -> both grid axes stay serial
            dimension_semantics=("arbitrary", "arbitrary"),
            vmem_limit_bytes=32 * 1024 * 1024),
        cost_estimate=cost2,
    )(h1, adj_p, inv_p, b2.astype(jnp.float32), w2.astype(jnp.float32),
      pool_p, wm_p, bm_p)

    return out_p[:, :c]


def _build_pool_matrix(graph_sizes, num_nodes):
    """pool[g, n] = 1/graph_sizes[g] for nodes belonging to graph g (contiguous blocks)."""
    pool = jnp.zeros((len(graph_sizes), num_nodes), dtype=jnp.float32)
    acc = 0
    for gidx, sz in enumerate(graph_sizes):
        pool = pool.at[gidx, acc:acc + sz].set(1.0 / sz)
        acc += sz
    return pool


def _reference(node_feat, adj, inv_degs, w1, b1, w2, b2, pool, wm, bm):
    x = jnp.maximum(jnp.dot(adj, jnp.dot(node_feat, w1)) * inv_degs + b1, 0.0)
    x = jnp.dot(adj, jnp.dot(x, w2)) * inv_degs + b2
    gr = jnp.dot(pool, x)
    logits = jnp.dot(gr, wm) + bm
    return jax.nn.log_softmax(logits, axis=1)


if __name__ == "__main__":
    key = jax.random.PRNGKey(0)

    # Small shapes consistent with the module's forward.
    nfeat, nhid, nclass = 8, 32, 4
    graph_sizes = [7, 9]               # 2 graphs, 16 nodes total
    N = sum(graph_sizes)
    G = len(graph_sizes)

    keys = jax.random.split(key, 6)

    node_feat = jax.random.normal(keys[0], (N, nfeat), dtype=jnp.float32)

    # Dense symmetric adjacency with self loops (stands in for n2n_sp).
    a = (jax.random.uniform(keys[1], (N, N)) < 0.3).astype(jnp.float32)
    adj = jnp.maximum(a, a.T)
    adj = jnp.maximum(adj, jnp.eye(N, dtype=jnp.float32))
    degs = jnp.sum(adj, axis=1, keepdims=True)      # node_degs
    inv_degs = 1.0 / degs

    w1 = jax.random.normal(keys[2], (nfeat, nhid), dtype=jnp.float32) * 0.1
    b1 = jnp.zeros((1, nhid), dtype=jnp.float32)
    w2 = jax.random.normal(keys[3], (nhid, nhid), dtype=jnp.float32) * 0.1
    b2 = jnp.zeros((1, nhid), dtype=jnp.float32)
    wm = jax.random.normal(keys[4], (nhid, nclass), dtype=jnp.float32) * 0.1
    bm = jax.random.normal(keys[5], (1, nclass), dtype=jnp.float32) * 0.1

    pool = _build_pool_matrix(graph_sizes, N)

    # TODO(synk): dropout is identity (inference path); training-time dropout not implemented.
    out = gcn_forward(node_feat, adj, inv_degs, w1, b1, w2, b2, pool, wm, bm)
    out = jax.block_until_ready(out)

    ref = _reference(node_feat, adj, inv_degs, w1, b1, w2, b2, pool, wm, bm)

    assert out.shape == (G, nclass)
    assert jnp.allclose(jnp.sum(jnp.exp(out), axis=1), 1.0, atol=1e-4)
    assert float(jnp.max(jnp.abs(out - ref))) < 5e-2, float(jnp.max(jnp.abs(out - ref)))

    print("KERNEL_OK")
</pallas_src>

<mosaic_0001>
module attributes {stable_mosaic.version = 11 : i64} {
  func.func @_gc1_kernel(%arg0: i32, %arg1: i32, %arg2: memref<128x8xf32, #tpu.memory_space<vmem>>, %arg3: memref<128x128xbf16, #tpu.memory_space<vmem>>, %arg4: memref<128x1xf32, #tpu.memory_space<vmem>>, %arg5: memref<1x32xf32, #tpu.memory_space<vmem>>, %arg6: memref<8x32xf32, #tpu.memory_space<vmem>>, %arg7: memref<128x32xf32, #tpu.memory_space<vmem>>, %arg8: memref<128x32xf32, #tpu.memory_space<vmem>>) attributes {dimension_semantics = [#tpu.dimension_semantics<parallel>, #tpu.dimension_semantics<arbitrary>], iteration_bounds = array<i64: 1, 1>, scalar_prefetch = 0 : i64, scratch_operands = 1 : i64, tpu.core_type = #tpu.core_type<tc>, window_params = [{transform_indices = @transform_0, window_bounds = array<i64: 128, 8>}, {transform_indices = @transform_1, window_bounds = array<i64: 128, 128>}, {transform_indices = @transform_2, window_bounds = array<i64: 128, 1>}, {pipeline_mode = #tpu.pipeline_mode<synchronous>, transform_indices = @transform_3, window_bounds = array<i64: 1, 32>}, {pipeline_mode = #tpu.pipeline_mode<synchronous>, transform_indices = @transform_4, window_bounds = array<i64: 8, 32>}, {transform_indices = @transform_5, window_bounds = array<i64: 128, 32>}]} {
    %c0_i32 = arith.constant 0 : i32
    %0 = arith.cmpi eq, %arg1, %c0_i32 : i32
    %1 = arith.extui %0 : i1 to i32
    %c0_i32_0 = arith.constant 0 : i32
    %2 = arith.cmpi ne, %1, %c0_i32_0 : i32
    scf.if %2 {
      %cst_13 = arith.constant 0.000000e+00 : f32
      %15 = vector.broadcast %cst_13 : f32 to vector<128x32xf32>
      %c0_14 = arith.constant 0 : index
      %c0_15 = arith.constant 0 : index
      %16 = vector.load %arg8[%c0_14, %c0_15] : memref<128x32xf32, #tpu.memory_space<vmem>>, vector<128x32xf32>
      tpu.vector_store %arg8[%c0_14, %c0_15], %15 {strides = array<i32>} : memref<128x32xf32, #tpu.memory_space<vmem>>, vector<128x32xf32>,
    } else {
    }
    %c0 = arith.constant 0 : index
    %c0_1 = arith.constant 0 : index
    %3 = vector.load %arg2[%c0, %c0_1] : memref<128x8xf32, #tpu.memory_space<vmem>>, vector<128x8xf32>
    %c0_2 = arith.constant 0 : index
    %c0_3 = arith.constant 0 : index
    %4 = vector.load %arg6[%c0_2, %c0_3] : memref<8x32xf32, #tpu.memory_space<vmem>>, vector<8x32xf32>
    %cst = arith.constant dense<0.000000e+00> : vector<128x32xf32>
    %5 = tpu.matmul %3, %4, %cst {dimension_numbers = #tpu.dot_dimension_numbers<[1], [0], [0], [1], [0, 0, 1, 1], [], []>} : vector<128x8xf32>, vector<8x32xf32>, vector<128x32xf32> -> vector<128x32xf32>
    %c0_4 = arith.constant 0 : index
    %c0_5 = arith.constant 0 : index
    %6 = vector.load %arg8[%c0_4, %c0_5] : memref<128x32xf32, #tpu.memory_space<vmem>>, vector<128x32xf32>
    %c0_6 = arith.constant 0 : index
    %c0_7 = arith.constant 0 : index
    %7 = vector.load %arg3[%c0_6, %c0_7] : memref<128x128xbf16, #tpu.memory_space<vmem>>, vector<128x128xbf16>
    %8 = arith.truncf %5 : vector<128x32xf32> to vector<128x32xbf16>
    %cst_8 = arith.constant dense<0.000000e+00> : vector<128x32xf32>
    %9 = tpu.matmul %7, %8, %cst_8 {dimension_numbers = #tpu.dot_dimension_numbers<[1], [0], [0], [1], [0, 0, 1, 1], [], []>} : vector<128x128xbf16>, vector<128x32xbf16>, vector<128x32xf32> -> vector<128x32xf32>
    %10 = arith.addf %6, %9 : vector<128x32xf32>
    %c0_9 = arith.constant 0 : index
    %c0_10 = arith.constant 0 : index
    %11 = vector.load %arg8[%c0_9, %c0_10] : memref<128x32xf32, #tpu.memory_space<vmem>>, vector<128x32xf32>
    tpu.vector_store %arg8[%c0_9, %c0_10], %10 {strides = array<i32>} : memref<128x32xf32, #tpu.memory_space<vmem>>, vector<128x32xf32>,
    %c0_i32_11 = arith.constant 0 : i32
    %12 = arith.cmpi eq, %arg1, %c0_i32_11 : i32
    %13 = arith.extui %12 : i1 to i32
    %c0_i32_12 = arith.constant 0 : i32
    %14 = arith.cmpi ne, %13, %c0_i32_12 : i32
    scf.if %14 {
      %c0_13 = arith.constant 0 : index
      %c0_14 = arith.constant 0 : index
      %15 = vector.load %arg8[%c0_13, %c0_14] : memref<128x32xf32, #tpu.memory_space<vmem>>, vector<128x32xf32>
      %c0_15 = arith.constant 0 : index
      %c0_16 = arith.constant 0 : index
      %16 = vector.load %arg4[%c0_15, %c0_16] : memref<128x1xf32, #tpu.memory_space<vmem>>, vector<128x1xf32>
      %17 = vector.broadcast %16 : vector<128x1xf32> to vector<128x32xf32>
      %18 = arith.mulf %15, %17 : vector<128x32xf32>
      %c0_17 = arith.constant 0 : index
      %c0_18 = arith.constant 0 : index
      %19 = vector.load %arg5[%c0_17, %c0_18] : memref<1x32xf32, #tpu.memory_space<vmem>>, vector<1x32xf32>
      %20 = vector.broadcast %19 : vector<1x32xf32> to vector<128x32xf32>
      %21 = arith.addf %18, %20 : vector<128x32xf32>
      %cst_19 = arith.constant 0.000000e+00 : f32
      %22 = vector.broadcast %cst_19 : f32 to vector<128x32xf32>
      %23 = arith.maximumf %21, %22 : vector<128x32xf32>
      %c0_20 = arith.constant 0 : index
      %c0_21 = arith.constant 0 : index
      %24 = vector.load %arg7[%c0_20, %c0_21] : memref<128x32xf32, #tpu.memory_space<vmem>>, vector<128x32xf32>
      tpu.vector_store %arg7[%c0_20, %c0_21], %23 {strides = array<i32>} : memref<128x32xf32, #tpu.memory_space<vmem>>, vector<128x32xf32>,
    } else {
    }
    return
  }
  func.func @transform_0(%arg0: i32, %arg1: i32) -> (i32, i32) {
    %c0_i32 = arith.constant 0 : i32
    %c0_i32_0 = arith.constant 0 : i32
    return %arg1, %c0_i32 : i32, i32
  }
  func.func @transform_1(%arg0: i32, %arg1: i32) -> (i32, i32) {
    %c0_i32 = arith.constant 0 : i32
    return %arg0, %arg1 : i32, i32
  }
  func.func @transform_2(%arg0: i32, %arg1: i32) -> (i32, i32) {
    %c0_i32 = arith.constant 0 : i32
    %c0_i32_0 = arith.constant 0 : i32
    return %arg0, %c0_i32 : i32, i32
  }
  func.func @transform_3(%arg0: i32, %arg1: i32) -> (i32, i32) {
    %c0_i32 = arith.constant 0 : i32
    %c0_i32_0 = arith.constant 0 : i32
    %c0_i32_1 = arith.constant 0 : i32
    return %c0_i32, %c0_i32_0 : i32, i32
  }
  func.func @transform_4(%arg0: i32, %arg1: i32) -> (i32, i32) {
    %c0_i32 = arith.constant 0 : i32
    %c0_i32_0 = arith.constant 0 : i32
    %c0_i32_1 = arith.constant 0 : i32
    return %c0_i32, %c0_i32_0 : i32, i32
  }
  func.func @transform_5(%arg0: i32, %arg1: i32) -> (i32, i32) {
    %c0_i32 = arith.constant 0 : i32
    %c0_i32_0 = arith.constant 0 : i32
    return %arg0, %c0_i32 : i32, i32
  }
}

module attributes {stable_mosaic.version = 11 : i64} {
  func.func @_gc2_pool_mlp_kernel(%arg0: i32, %arg1: i32, %arg2: memref<128x32xf32, #tpu.memory_space<vmem>>, %arg3: memref<128x128xbf16, #tpu.memory_space<vmem>>, %arg4: memref<128x1xf32, #tpu.memory_space<vmem>>, %arg5: memref<1x32xf32, #tpu.memory_space<vmem>>, %arg6: memref<32x32xf32, #tpu.memory_space<vmem>>, %arg7: memref<2x128xf32, #tpu.memory_space<vmem>>, %arg8: memref<32x128xf32, #tpu.memory_space<vmem>>, %arg9: memref<1x128xf32, #tpu.memory_space<vmem>>, %arg10: memref<2x128xf32, #tpu.memory_space<vmem>>, %arg11: memref<128x32xf32, #tpu.memory_space<vmem>>, %arg12: memref<2x32xf32, #tpu.memory_space<vmem>>) attributes {dimension_semantics = [#tpu.dimension_semantics<arbitrary>, #tpu.dimension_semantics<arbitrary>], iteration_bounds = array<i64: 1, 1>, scalar_prefetch = 0 : i64, scratch_operands = 2 : i64, tpu.core_type = #tpu.core_type<tc>, window_params = [{transform_indices = @transform_0, window_bounds = array<i64: 128, 32>}, {transform_indices = @transform_1, window_bounds = array<i64: 128, 128>}, {transform_indices = @transform_2, window_bounds = array<i64: 128, 1>}, {pipeline_mode = #tpu.pipeline_mode<synchronous>, transform_indices = @transform_3, window_bounds = array<i64: 1, 32>}, {pipeline_mode = #tpu.pipeline_mode<synchronous>, transform_indices = @transform_4, window_bounds = array<i64: 32, 32>}, {transform_indices = @transform_5, window_bounds = array<i64: 2, 128>}, {pipeline_mode = #tpu.pipeline_mode<synchronous>, transform_indices = @transform_6, window_bounds = array<i64: 32, 128>}, {pipeline_mode = #tpu.pipeline_mode<synchronous>, transform_indices = @transform_7, window_bounds = array<i64: 1, 128>}, {pipeline_mode = #tpu.pipeline_mode<synchronous>, transform_indices = @transform_8, window_bounds = array<i64: 2, 128>}]} {
    %c0_i32 = arith.constant 0 : i32
    %0 = arith.cmpi eq, %arg0, %c0_i32 : i32
    %c0_i32_0 = arith.constant 0 : i32
    %1 = arith.cmpi eq, %arg1, %c0_i32_0 : i32
    %2 = arith.andi %0, %1 : i1
    %3 = arith.extui %2 : i1 to i32
    %c0_i32_1 = arith.constant 0 : i32
    %4 = arith.cmpi ne, %3, %c0_i32_1 : i32
    scf.if %4 {
      %cst_19 = arith.constant 0.000000e+00 : f32
      %25 = vector.broadcast %cst_19 : f32 to vector<2x32xf32>
      %c0_20 = arith.constant 0 : index
      %c0_21 = arith.constant 0 : index
      %26 = vector.load %arg12[%c0_20, %c0_21] : memref<2x32xf32, #tpu.memory_space<vmem>>, vector<2x32xf32>
      tpu.vector_store %arg12[%c0_20, %c0_21], %25 {strides = array<i32>} : memref<2x32xf32, #tpu.memory_space<vmem>>, vector<2x32xf32>,
    } else {
    }
    %c0_i32_2 = arith.constant 0 : i32
    %5 = arith.cmpi eq, %arg1, %c0_i32_2 : i32
    %6 = arith.extui %5 : i1 to i32
    %c0_i32_3 = arith.constant 0 : i32
    %7 = arith.cmpi ne, %6, %c0_i32_3 : i32
    scf.if %7 {
      %cst_19 = arith.constant 0.000000e+00 : f32
      %25 = vector.broadcast %cst_19 : f32 to vector<128x32xf32>
      %c0_20 = arith.constant 0 : index
      %c0_21 = arith.constant 0 : index
      %26 = vector.load %arg11[%c0_20, %c0_21] : memref<128x32xf32, #tpu.memory_space<vmem>>, vector<128x32xf32>
      tpu.vector_store %arg11[%c0_20, %c0_21], %25 {strides = array<i32>} : memref<128x32xf32, #tpu.memory_space<vmem>>, vector<128x32xf32>,
    } else {
    }
    %c0 = arith.constant 0 : index
    %c0_4 = arith.constant 0 : index
    %8 = vector.load %arg2[%c0, %c0_4] : memref<128x32xf32, #tpu.memory_space<vmem>>, vector<128x32xf32>
    %c0_5 = arith.constant 0 : index
    %c0_6 = arith.constant 0 : index
    %9 = vector.load %arg6[%c0_5, %c0_6] : memref<32x32xf32, #tpu.memory_space<vmem>>, vector<32x32xf32>
    %cst = arith.constant dense<0.000000e+00> : vector<128x32xf32>
    %10 = tpu.matmul %8, %9, %cst {dimension_numbers = #tpu.dot_dimension_numbers<[1], [0], [0], [1], [0, 0, 1, 1], [], []>} : vector<128x32xf32>, vector<32x32xf32>, vector<128x32xf32> -> vector<128x32xf32>
    %c0_7 = arith.constant 0 : index
    %c0_8 = arith.constant 0 : index
    %11 = vector.load %arg11[%c0_7, %c0_8] : memref<128x32xf32, #tpu.memory_space<vmem>>, vector<128x32xf32>
    %c0_9 = arith.constant 0 : index
    %c0_10 = arith.constant 0 : index
    %12 = vector.load %arg3[%c0_9, %c0_10] : memref<128x128xbf16, #tpu.memory_space<vmem>>, vector<128x128xbf16>
    %13 = arith.truncf %10 : vector<128x32xf32> to vector<128x32xbf16>
    %cst_11 = arith.constant dense<0.000000e+00> : vector<128x32xf32>
    %14 = tpu.matmul %12, %13, %cst_11 {dimension_numbers = #tpu.dot_dimension_numbers<[1], [0], [0], [1], [0, 0, 1, 1], [], []>} : vector<128x128xbf16>, vector<128x32xbf16>, vector<128x32xf32> -> vector<128x32xf32>
    %15 = arith.addf %11, %14 : vector<128x32xf32>
    %c0_12 = arith.constant 0 : index
    %c0_13 = arith.constant 0 : index
    %16 = vector.load %arg11[%c0_12, %c0_13] : memref<128x32xf32, #tpu.memory_space<vmem>>, vector<128x32xf32>
    tpu.vector_store %arg11[%c0_12, %c0_13], %15 {strides = array<i32>} : memref<128x32xf32, #tpu.memory_space<vmem>>, vector<128x32xf32>,
    %c0_i32_14 = arith.constant 0 : i32
    %17 = arith.cmpi eq, %arg1, %c0_i32_14 : i32
    %18 = arith.extui %17 : i1 to i32
    %c0_i32_15 = arith.constant 0 : i32
    %19 = arith.cmpi ne, %18, %c0_i32_15 : i32
    scf.if %19 {
      %c0_19 = arith.constant 0 : index
      %c0_20 = arith.constant 0 : index
      %25 = vector.load %arg11[%c0_19, %c0_20] : memref<128x32xf32, #tpu.memory_space<vmem>>, vector<128x32xf32>
      %c0_21 = arith.constant 0 : index
      %c0_22 = arith.constant 0 : index
      %26 = vector.load %arg4[%c0_21, %c0_22] : memref<128x1xf32, #tpu.memory_space<vmem>>, vector<128x1xf32>
      %27 = vector.broadcast %26 : vector<128x1xf32> to vector<128x32xf32>
      %28 = arith.mulf %25, %27 : vector<128x32xf32>
      %c0_23 = arith.constant 0 : index
      %c0_24 = arith.constant 0 : index
      %29 = vector.load %arg5[%c0_23, %c0_24] : memref<1x32xf32, #tpu.memory_space<vmem>>, vector<1x32xf32>
      %30 = vector.broadcast %29 : vector<1x32xf32> to vector<128x32xf32>
      %31 = arith.addf %28, %30 : vector<128x32xf32>
      %c0_25 = arith.constant 0 : index
      %c0_26 = arith.constant 0 : index
      %32 = vector.load %arg12[%c0_25, %c0_26] : memref<2x32xf32, #tpu.memory_space<vmem>>, vector<2x32xf32>
      %c0_27 = arith.constant 0 : index
      %c0_28 = arith.constant 0 : index
      %33 = vector.load %arg7[%c0_27, %c0_28] : memref<2x128xf32, #tpu.memory_space<vmem>>, vector<2x128xf32>
      %cst_29 = arith.constant dense<0.000000e+00> : vector<2x32xf32>
      %34 = tpu.matmul %33, %31, %cst_29 {dimension_numbers = #tpu.dot_dimension_numbers<[1], [0], [0], [1], [0, 0, 1, 1], [], []>} : vector<2x128xf32>, vector<128x32xf32>, vector<2x32xf32> -> vector<2x32xf32>
      %35 = arith.addf %32, %34 : vector<2x32xf32>
      %c0_30 = arith.constant 0 : index
      %c0_31 = arith.constant 0 : index
      %36 = vector.load %arg12[%c0_30, %c0_31] : memref<2x32xf32, #tpu.memory_space<vmem>>, vector<2x32xf32>
      tpu.vector_store %arg12[%c0_30, %c0_31], %35 {strides = array<i32>} : memref<2x32xf32, #tpu.memory_space<vmem>>, vector<2x32xf32>,
    } else {
    }
    %c0_i32_16 = arith.constant 0 : i32
    %20 = arith.cmpi eq, %arg0, %c0_i32_16 : i32
    %c0_i32_17 = arith.constant 0 : i32
    %21 = arith.cmpi eq, %arg1, %c0_i32_17 : i32
    %22 = arith.andi %20, %21 : i1
    %23 = arith.extui %22 : i1 to i32
    %c0_i32_18 = arith.constant 0 : i32
    %24 = arith.cmpi ne, %23, %c0_i32_18 : i32
    scf.if %24 {
      %c0_19 = arith.constant 0 : index
      %c0_20 = arith.constant 0 : index
      %25 = vector.load %arg12[%c0_19, %c0_20] : memref<2x32xf32, #tpu.memory_space<vmem>>, vector<2x32xf32>
      %c0_21 = arith.constant 0 : index
      %c0_22 = arith.constant 0 : index
      %26 = vector.load %arg8[%c0_21, %c0_22] : memref<32x128xf32, #tpu.memory_space<vmem>>, vector<32x128xf32>
      %cst_23 = arith.constant dense<0.000000e+00> : vector<2x128xf32>
      %27 = tpu.matmul %25, %26, %cst_23 {dimension_numbers = #tpu.dot_dimension_numbers<[1], [0], [0], [1], [0, 0, 1, 1], [], []>} : vector<2x32xf32>, vector<32x128xf32>, vector<2x128xf32> -> vector<2x128xf32>
      %c0_24 = arith.constant 0 : index
      %c0_25 = arith.constant 0 : index
      %28 = vector.load %arg9[%c0_24, %c0_25] : memref<1x128xf32, #tpu.memory_space<vmem>>, vector<1x128xf32>
      %29 = vector.broadcast %28 : vector<1x128xf32> to vector<2x128xf32>
      %30 = arith.addf %27, %29 : vector<2x128xf32>
      %cst_26 = arith.constant dense<0xFF800000> : vector<2xf32>
      %31 = vector.multi_reduction <maximumf>, %30, %cst_26 [1] : vector<2x128xf32> to vector<2xf32>
      %32 = vector.shape_cast %31 : vector<2xf32> to vector<2x1xf32>
      %33 = vector.broadcast %32 : vector<2x1xf32> to vector<2x128xf32>
      %34 = arith.subf %30, %33 : vector<2x128xf32>
      %35 = math.exp %34 : vector<2x128xf32>
      %cst_27 = arith.constant dense<0.000000e+00> : vector<2xf32>
      %36 = vector.multi_reduction <add>, %35, %cst_27 [1] : vector<2x128xf32> to vector<2xf32>
      %37 = vector.shape_cast %36 : vector<2xf32> to vector<2x1xf32>
      %38 = math.log %37 : vector<2x1xf32>
      %39 = vector.broadcast %38 : vector<2x1xf32> to vector<2x128xf32>
      %40 = arith.subf %34, %39 : vector<2x128xf32>
      %c0_28 = arith.constant 0 : index
      %c0_29 = arith.constant 0 : index
      %41 = vector.load %arg10[%c0_28, %c0_29] : memref<2x128xf32, #tpu.memory_space<vmem>>, vector<2x128xf32>
      tpu.vector_store %arg10[%c0_28, %c0_29], %40 {strides = array<i32>} : memref<2x128xf32, #tpu.memory_space<vmem>>, vector<2x128xf32>,
    } else {
    }
    return
  }
  func.func @transform_0(%arg0: i32, %arg1: i32) -> (i32, i32) {
    %c0_i32 = arith.constant 0 : i32
    %c0_i32_0 = arith.constant 0 : i32
    return %arg1, %c0_i32 : i32, i32
  }
  func.func @transform_1(%arg0: i32, %arg1: i32) -> (i32, i32) {
    %c0_i32 = arith.constant 0 : i32
    return %arg0, %arg1 : i32, i32
  }
  func.func @transform_2(%arg0: i32, %arg1: i32) -> (i32, i32) {
    %c0_i32 = arith.constant 0 : i32
    %c0_i32_0 = arith.constant 0 : i32
    return %arg0, %c0_i32 : i32, i32
  }
  func.func @transform_3(%arg0: i32, %arg1: i32) -> (i32, i32) {
    %c0_i32 = arith.constant 0 : i32
    %c0_i32_0 = arith.constant 0 : i32
    %c0_i32_1 = arith.constant 0 : i32
    return %c0_i32, %c0_i32_0 : i32, i32
  }
  func.func @transform_4(%arg0: i32, %arg1: i32) -> (i32, i32) {
    %c0_i32 = arith.constant 0 : i32
    %c0_i32_0 = arith.constant 0 : i32
    %c0_i32_1 = arith.constant 0 : i32
    return %c0_i32, %c0_i32_0 : i32, i32
  }
  func.func @transform_5(%arg0: i32, %arg1: i32) -> (i32, i32) {
    %c0_i32 = arith.constant 0 : i32
    %c0_i32_0 = arith.constant 0 : i32
    return %c0_i32, %arg0 : i32, i32
  }
  func.func @transform_6(%arg0: i32, %arg1: i32) -> (i32, i32) {
    %c0_i32 = arith.constant 0 : i32
    %c0_i32_0 = arith.constant 0 : i32
    %c0_i32_1 = arith.constant 0 : i32
    return %c0_i32, %c0_i32_0 : i32, i32
  }
  func.func @transform_7(%arg0: i32, %arg1: i32) -> (i32, i32) {
    %c0_i32 = arith.constant 0 : i32
    %c0_i32_0 = arith.constant 0 : i32
    %c0_i32_1 = arith.constant 0 : i32
    return %c0_i32, %c0_i32_0 : i32, i32
  }
  func.func @transform_8(%arg0: i32, %arg1: i32) -> (i32, i32) {
    %c0_i32 = arith.constant 0 : i32
    %c0_i32_0 = arith.constant 0 : i32
    %c0_i32_1 = arith.constant 0 : i32
    return %c0_i32, %c0_i32_0 : i32, i32
  }
}

</mosaic_0001>

<bundles_post_ra>
// kernel: gcn_forward.2
= control target key start
LH: loop header
LB: loop body
LE: loop exit
PB: predicated region body
PF: predicated region fallthrough
CT: control target
= control target key end

     0   :  { %vm59_vm0 = vcmask 64512   ;;  %v805_v19 = vmov 0   ;;  %vm25_vm1 = vcmask 261120   ;;  %v806_v34 = vmov 0.0   ;;  %s1108_s4 = inlined_call_operand.vmem [shape: f32[8,32], index: 4, kind: input, shape index: {}]   ;;  %s1109_s0 = inlined_call_operand.vmem [shape: f32[128,8], index: 0, kind: input, shape index: {}]   ;;  %s1110_s1 = inlined_call_operand.vmem [shape: bf16[128,128], index: 1, kind: input, shape index: {}]   ;;  %s1111_s2 = inlined_call_operand.vmem [shape: f32[128,1], index: 2, kind: input, shape index: {}]   ;;  %s1112_s3 = inlined_call_operand.vmem [shape: f32[1,32], index: 3, kind: input, shape index: {}]   ;;  %s1113_s5 = inlined_call_operand.vmem [shape: f32[128,32], index: 5, kind: output, shape index: {}]  }
   0x1   :  { %v58_v0 = vld [vmem:[%s1108_s4] sm:$0xff]  ;;  %v43_v2 = vld [vmem:[%s1109_s0 + $0x8] sm:$0xff]  ;;  %v44_v3 = vld [vmem:[%s1109_s0 + $0x10] sm:$0xff]  ;;  %796 = vset.pattern.permute.xlu1 %v805_v19  ;;  %795 = vset.pattern.permute.xlu0 %v805_v19  ;;  %28 = vst.msk [vmem:[#allocation2 + $0x10] sm:$0xff] %vm25_vm1, %v806_v34 }
   0x2   :  { %v42_v1 = vld [vmem:[%s1109_s0] sm:$0xff]  ;;  %719 = vmatprep.subr.mxu0 %v58_v0  ;;  %v45_v4 = vld [vmem:[%s1109_s0 + $0x18] sm:$0xff]  ;;  %v47_v6 = vld [vmem:[%s1109_s0 + $0x28] sm:$0xff]  ;;  %26 = vst.msk [vmem:[#allocation2] sm:$0xff] %vm25_vm1, %v806_v34 }
   0x3   :  { %721 = vmatprep.mubr.msk.f32.mxu0 %vm59_vm0, %v42_v1  ;;  %720 = vmatpush3.msra.mxu0 %v58_v0  ;;  %v46_v5 = vld [vmem:[%s1109_s0 + $0x20] sm:$0xff]  ;;  %v48_v7 = vld [vmem:[%s1109_s0 + $0x30] sm:$0xff]  ;;  %v49_v8 = vld [vmem:[%s1109_s0 + $0x38] sm:$0xff]  ;;  %27 = vst.msk [vmem:[#allocation2 + $0x8] sm:$0xff] %vm25_vm1, %v806_v34 }
   0x4   :  { %722 = vmatmul.mubr.msk.f32.vlgmr.msra.gmra.mrb[0].mxu0 %vm59_vm0, %v43_v2  ;;  %v50_v9 = vld [vmem:[%s1109_s0 + $0x40] sm:$0xff]  ;;  %v51_v10 = vld [vmem:[%s1109_s0 + $0x48] sm:$0xff]  ;;  %v52_v11 = vld [vmem:[%s1109_s0 + $0x50] sm:$0xff]  ;;  %29 = vst.msk [vmem:[#allocation2 + $0x18] sm:$0xff] %vm25_vm1, %v806_v34 }
   0x5   :  { %724 = vmatprep.mubr.msk.f32.mxu0 %vm59_vm0, %v44_v3  ;;  %v53_v12 = vld [vmem:[%s1109_s0 + $0x58] sm:$0xff]  ;;  %v54_v13 = vld [vmem:[%s1109_s0 + $0x60] sm:$0xff]  ;;  %v55_v14 = vld [vmem:[%s1109_s0 + $0x68] sm:$0xff]  ;;  %30 = vst.msk [vmem:[#allocation2 + $0x20] sm:$0xff] %vm25_vm1, %v806_v34 }
   0x6   :  { %v56_v15 = vld [vmem:[%s1109_s0 + $0x70] sm:$0xff]  ;;  %v57_v16 = vld [vmem:[%s1109_s0 + $0x78] sm:$0xff]  ;;  %v797_v17 = vld [vmem:[%s1110_s1] sm:$0xff]   ;;  %31 = vst.msk [vmem:[#allocation2 + $0x28] sm:$0xff] %vm25_vm1, %v806_v34 }
   0x7   :  { %v798_v18 = vld [vmem:[%s1110_s1 + $0x10] sm:$0xff]   ;;  %v490_v21 = vld [vmem:[%s1111_s2] sm:$0xff]  ;;  %v493_v22 = vld [vmem:[%s1111_s2 + $0x18] sm:$0xff]  ;;  %32 = vst.msk [vmem:[#allocation2 + $0x30] sm:$0xff] %vm25_vm1, %v806_v34 }
   0x8   :  { %725 = vmatmul.mubr.msk.f32.gmra.mrb[2].mxu0 %vm59_vm0, %v45_v4  ;;  %765 = vmatprep.mubr.bf16.mxu1 %v798_v18  ;;  %v492_v20 = vld [vmem:[%s1111_s2 + $0x10] sm:$0xff]  ;;  %v491_v23 = vld [vmem:[%s1111_s2 + $0x8] sm:$0xff]  ;;  %v494_v25 = vld [vmem:[%s1111_s2 + $0x20] sm:$0xff]  ;;  %33 = vst.msk [vmem:[#allocation2 + $0x38] sm:$0xff] %vm25_vm1, %v806_v34 }
   0x9   :  { %727 = vmatprep.mubr.msk.f32.mxu0 %vm59_vm0, %v46_v5  ;;  %518 = vperm.xlu1 %796, %v492_v20   ;;  %v495_v24 = vld [vmem:[%s1111_s2 + $0x28] sm:$0xff]  ;;  %v497_v26 = vld [vmem:[%s1111_s2 + $0x38] sm:$0xff]  ;;  %v496_v27 = vld [vmem:[%s1111_s2 + $0x30] sm:$0xff]  ;;  %34 = vst.msk [vmem:[#allocation2 + $0x40] sm:$0xff] %vm25_vm1, %v806_v34 }
   0xa   :  { %508 = vperm.xlu0 %795, %v490_v21   ;;  %v499_v28 = vld [vmem:[%s1111_s2 + $0x48] sm:$0xff]  ;;  %v498_v29 = vld [vmem:[%s1111_s2 + $0x40] sm:$0xff]  ;;  %v501_v30 = vld [vmem:[%s1111_s2 + $0x58] sm:$0xff]  ;;  %35 = vst.msk [vmem:[#allocation2 + $0x48] sm:$0xff] %vm25_vm1, %v806_v34 }
   0xb   :  { %v500_v31 = vld [vmem:[%s1111_s2 + $0x50] sm:$0xff]  ;;  %v503_v32 = vld [vmem:[%s1111_s2 + $0x68] sm:$0xff]  ;;  %v502_v33 = vld [vmem:[%s1111_s2 + $0x60] sm:$0xff]  ;;  %36 = vst.msk [vmem:[#allocation2 + $0x50] sm:$0xff] %vm25_vm1, %v806_v34 }
   0xc   :  { %728 = vmatmul.mubr.msk.f32.gmra.mrb[4].mxu0 %vm59_vm0, %v47_v6  ;;  %37 = vst.msk [vmem:[#allocation2 + $0x58] sm:$0xff] %vm25_vm1, %v806_v34  ;;  %38 = vst.msk [vmem:[#allocation2 + $0x60] sm:$0xff] %vm25_vm1, %v806_v34  ;;  %v505_v35 = vld [vmem:[%s1111_s2 + $0x78] sm:$0xff]  ;;  %v504_v36 = vld [vmem:[%s1111_s2 + $0x70] sm:$0xff] }
   0xd   :  { %730 = vmatprep.mubr.msk.f32.mxu0 %vm59_vm0, %v48_v7  ;;  %523 = vperm.xlu1 %796, %v493_v22   ;;  %39 = vst.msk [vmem:[#allocation2 + $0x68] sm:$0xff] %vm25_vm1, %v806_v34  ;;  %40 = vst.msk [vmem:[#allocation2 + $0x70] sm:$0xff] %vm25_vm1, %v806_v34  ;;  %v799_v61 = vld [vmem:[%s1110_s1 + $0x8] sm:$0xff]   ;;  %v800_v62 = vld [vmem:[%s1110_s1 + $0x18] sm:$0xff]  }
   0xe   :  { %513 = vperm.xlu0 %795, %v491_v23   ;;  %41 = vst.msk [vmem:[#allocation2 + $0x78] sm:$0xff] %vm25_vm1, %v806_v34  ;;  %v801_v63 = vld [vmem:[%s1110_s1 + $0x20] sm:$0xff]   ;;  %v802_v0 = vld [vmem:[%s1110_s1 + $0x28] sm:$0xff]   ;;  %v803_v1 = vld [vmem:[%s1110_s1 + $0x30] sm:$0xff]  }
   0xf   :  { %v804_v2 = vld [vmem:[%s1110_s1 + $0x38] sm:$0xff]   ;;  %v254_v22 = vld [vmem:[#allocation2 + $0x8] sm:$0xff] }
  0x10   :  { %731 = vmatmul.mubr.msk.f32.gmra.mrb[6].mxu0 %vm59_vm0, %v49_v8  ;;  %v258_v23 = vld [vmem:[#allocation2 + $0x28] sm:$0xff] }
  0x11   :  { %733 = vmatprep.mubr.msk.f32.mxu0 %vm59_vm0, %v50_v9  ;;  %533 = vperm.xlu1 %796, %v495_v24   ;;  %v255_v9 = vld [vmem:[#allocation2 + $0x10] sm:$0xff] }
  0x12   :  { %528 = vperm.xlu0 %795, %v494_v25  }
  0x14   :  { %734 = vmatmul.mubr.msk.f32.gmra.mrb[8].mxu0 %vm59_vm0, %v51_v10  ;;  %v259_v10 = vld [vmem:[#allocation2 + $0x30] sm:$0xff] }
  0x15   :  { %736 = vmatprep.mubr.msk.f32.mxu0 %vm59_vm0, %v52_v11  ;;  %543 = vperm.xlu1 %796, %v497_v26  }
  0x16   :  { %538 = vperm.xlu0 %795, %v496_v27  }
  0x18   :  { %737 = vmatmul.mubr.msk.f32.gmra.mrb[10].mxu0 %vm59_vm0, %v53_v12  ;;  %v253_v12 = vld [vmem:[#allocation2] sm:$0xff] }
  0x19   :  { %739 = vmatprep.mubr.msk.f32.mxu0 %vm59_vm0, %v54_v13  ;;  %553 = vperm.xlu1 %796, %v499_v28   ;;  %v257_v13 = vld [vmem:[#allocation2 + $0x20] sm:$0xff] }
  0x1a   :  { %548 = vperm.xlu0 %795, %v498_v29  }
  0x1c   :  { %740 = vmatmul.mubr.msk.f32.gmra.mrb[12].mxu0 %vm59_vm0, %v55_v14 }
  0x1d   :  { %742 = vmatprep.mubr.msk.f32.mxu0 %vm59_vm0, %v56_v15  ;;  %563 = vperm.xlu1 %796, %v501_v30  }
  0x1e   :  { %558 = vperm.xlu0 %795, %v500_v31  }
  0x20   :  { %743 = vmatmul.mubr.msk.f32.gmra.mrb[14].mxu0 %vm59_vm0, %v57_v16  ;;  %v256_v16 = vld [vmem:[#allocation2 + $0x18] sm:$0xff] }
  0x21   :  { %761 = vmatprep.mubr.bf16.mxu0 %v797_v17  ;;  %573 = vperm.xlu1 %796, %v503_v32   ;;  %v260_v17 = vld [vmem:[#allocation2 + $0x38] sm:$0xff] }
  0x22   :  { %568 = vperm.xlu0 %795, %v502_v33  }
  0x25   :  { %583 = vperm.xlu1 %796, %v505_v35   ;;  %v263_v35 = vld [vmem:[#allocation2 + $0x50] sm:$0xff] }
  0x26   :  { %578 = vperm.xlu0 %795, %v504_v36   ;;  %v261_v36 = vld [vmem:[#allocation2 + $0x40] sm:$0xff] }
  0x88   :  { %v519_v4 = vpop.permute.xlu1 %518 }
  0x89   :  { %v509_v3 = vpop.permute.xlu0 %508 }
  0x8c   :  { %v994_v6 = vpop.permute.xlu1 %523 }
  0x8d   :  { %v992_v5 = vpop.permute.xlu0 %513 }
  0x90   :  { %v996_v8 = vpop.permute.xlu1 %533 }
  0x91   :  { %v529_v7 = vpop.permute.xlu0 %528 }
  0x94   :  { %v544_v32 = vpop.permute.xlu1 %543 }
  0x95   :  { %v539_v11 = vpop.permute.xlu0 %538 }
  0xd7   :  { %v723_v37 = vpop.f32.mrb[0].mxu0 }
  0xd8   :  { %v174_v38 = vpop.f32.mrb[1].mxu0 }
  0xd9   :  { %v285_v39 = vpack.c.bf16 %v723_v37, %v174_v38  ;;  %v1006_v37 = vpop.permute.xlu0 %548 }
  0xdb   :  { %v726_v40 = vpop.f32.mrb[2].mxu0  ;;  %745 = vmatprep.subr.bf16.mxu0 %v285_v39  ;;  %777 = vmatprep.subr.bf16.mxu1 %v285_v39 }
  0xdc   :  { %v184_v41 = vpop.f32.mrb[3].mxu0  ;;  %746 = vmatpush3.bf16.msra.mxu0 %v285_v39  ;;  %785 = vmatpush3.bf16.msra.mxu1 %v285_v39  ;;  %v264_v39 = vld [vmem:[#allocation2 + $0x58] sm:$0xff] }
  0xdd   :  { %v286_v42 = vpack.c.bf16 %v726_v40, %v184_v41 }
  0xdf   :  { %v729_v43 = vpop.f32.mrb[4].mxu0  ;;  %747 = vmatprep.subr.bf16.mxu0 %v286_v42  ;;  %778 = vmatprep.subr.bf16.mxu1 %v286_v42 }
  0xe0   :  { %v194_v44 = vpop.f32.mrb[5].mxu0  ;;  %748 = vmatpush3.bf16.msra.mxu0 %v286_v42  ;;  %786 = vmatpush3.bf16.msra.mxu1 %v286_v42  ;;  %v262_v42 = vld [vmem:[#allocation2 + $0x48] sm:$0xff] }
  0xe1   :  { %v287_v45 = vpack.c.bf16 %v729_v43, %v194_v44  ;;  %v1008_v43 = vpop.permute.xlu1 %553 }
  0xe3   :  { %v732_v46 = vpop.f32.mrb[6].mxu0  ;;  %749 = vmatprep.subr.bf16.mxu0 %v287_v45  ;;  %779 = vmatprep.subr.bf16.mxu1 %v287_v45 }
  0xe4   :  { %v204_v47 = vpop.f32.mrb[7].mxu0  ;;  %750 = vmatpush3.bf16.msra.mxu0 %v287_v45  ;;  %787 = vmatpush3.bf16.msra.mxu1 %v287_v45  ;;  %v1013_v45 = vld [vmem:[%s1112_s3] ss:$0 sm:$0xff] }
  0xe5   :  { %v288_v48 = vpack.c.bf16 %v732_v46, %v204_v47 }
  0xe7   :  { %v735_v49 = vpop.f32.mrb[8].mxu0  ;;  %751 = vmatprep.subr.bf16.mxu0 %v288_v48  ;;  %780 = vmatprep.subr.bf16.mxu1 %v288_v48 }
  0xe8   :  { %v214_v50 = vpop.f32.mrb[9].mxu0  ;;  %752 = vmatpush3.bf16.msra.mxu0 %v288_v48  ;;  %788 = vmatpush3.bf16.msra.mxu1 %v288_v48 }
  0xe9   :  { %v289_v51 = vpack.c.bf16 %v735_v49, %v214_v50 }
  0xeb   :  { %v738_v52 = vpop.f32.mrb[10].mxu0  ;;  %753 = vmatprep.subr.bf16.mxu0 %v289_v51  ;;  %781 = vmatprep.subr.bf16.mxu1 %v289_v51 }
  0xec   :  { %v224_v53 = vpop.f32.mrb[11].mxu0  ;;  %754 = vmatpush3.bf16.msra.mxu0 %v289_v51  ;;  %789 = vmatpush3.bf16.msra.mxu1 %v289_v51 }
  0xed   :  { %v290_v54 = vpack.c.bf16 %v738_v52, %v224_v53 }
  0xef   :  { %v741_v55 = vpop.f32.mrb[12].mxu0  ;;  %755 = vmatprep.subr.bf16.mxu0 %v290_v54  ;;  %782 = vmatprep.subr.bf16.mxu1 %v290_v54 }
  0xf0   :  { %v234_v56 = vpop.f32.mrb[13].mxu0  ;;  %756 = vmatpush3.bf16.msra.mxu0 %v290_v54  ;;  %790 = vmatpush3.bf16.msra.mxu1 %v290_v54 }
  0xf1   :  { %v291_v57 = vpack.c.bf16 %v741_v55, %v234_v56 }
  0xf3   :  { %v744_v58 = vpop.f32.mrb[14].mxu0  ;;  %757 = vmatprep.subr.bf16.mxu0 %v291_v57  ;;  %783 = vmatprep.subr.bf16.mxu1 %v291_v57 }
  0xf4   :  { %v244_v59 = vpop.f32.mrb[15].mxu0  ;;  %758 = vmatpush3.bf16.msra.mxu0 %v291_v57  ;;  %791 = vmatpush3.bf16.msra.mxu1 %v291_v57 }
  0xf5   :  { %v292_v60 = vpack.c.bf16 %v744_v58, %v244_v59 }
  0xf7   :  { %759 = vmatprep.subr.bf16.mxu0 %v292_v60  ;;  %784 = vmatprep.subr.bf16.mxu1 %v292_v60 }
  0xf8   :  { %760 = vmatpush3.bf16.msra.mxu0 %v292_v60  ;;  %792 = vmatpush3.bf16.msra.mxu1 %v292_v60 }
  0xfb   :  { %762 = vmatmul.mubr.bf16.vlgmr.msra.gmra.mrb[16].mxu0 %v799_v61  ;;  %766 = vmatmul.mubr.bf16.vlgmr.msra.gmra.mrb[0].mxu1 %v800_v62 }
  0xfc   :  { %769 = vmatprep.mubr.bf16.mxu1 %v801_v63 }
 0x103   :  { %770 = vmatmul.mubr.bf16.gmra.mrb[4].mxu1 %v802_v0 }
 0x104   :  { %773 = vmatprep.mubr.bf16.mxu1 %v803_v1 }
 0x10b   :  { %774 = vmatmul.mubr.bf16.gmra.mrb[8].mxu1 %v804_v2  ;;  %v559_v2 = vpop.permute.xlu0 %558 }
 0x1ce   :  { %v763_v14 = vpop.f32.mrb[16].mxu0  ;;  %v767_v15 = vpop.f32.mrb[0].mxu1 }
 0x1cf   :  { %v440_v18 = vadd.f32 %v763_v14, %v255_v9  ;;  %v444_v19 = vadd.f32 %v767_v15, %v259_v10  ;;  %v375_v20 = vpop.f32.mrb[17].mxu0  ;;  %v391_v21 = vpop.f32.mrb[1].mxu1  ;;  %v267_v10 = vld [vmem:[#allocation2 + $0x70] sm:$0xff]  ;;  %v265_v14 = vld [vmem:[#allocation2 + $0x60] sm:$0xff] }
 0x1d0   :  { %v438_v24 = vadd.f32 %v375_v20, %v253_v12  ;;  %v442_v25 = vadd.f32 %v391_v21, %v257_v13  ;;  %v764_v26 = vpop.f32.mrb[18].mxu0  ;;  %v768_v27 = vpop.f32.mrb[2].mxu1  ;;  %v268_v20 = vld [vmem:[#allocation2 + $0x78] sm:$0xff] }
 0x1d1   :  { %457 = vst.msk [vmem:[#allocation2 + $0x10] sm:$0xff] %vm25_vm1, %v440_v18  ;;  %461 = vst.msk [vmem:[#allocation2 + $0x30] sm:$0xff] %vm25_vm1, %v444_v19  ;;  %v441_v28 = vadd.f32 %v764_v26, %v256_v16  ;;  %v445_v29 = vadd.f32 %v768_v27, %v260_v17  ;;  %v378_v30 = vpop.f32.mrb[19].mxu0  ;;  %v394_v31 = vpop.f32.mrb[3].mxu1 }
 0x1d2   :  { %455 = vst.msk [vmem:[#allocation2] sm:$0xff] %vm25_vm1, %v438_v24  ;;  %459 = vst.msk [vmem:[#allocation2 + $0x20] sm:$0xff] %vm25_vm1, %v442_v25  ;;  %v439_v33 = vadd.f32 %v378_v30, %v254_v22  ;;  %v443_v34 = vadd.f32 %v394_v31, %v258_v23  ;;  %v564_v15 = vpop.permute.xlu1 %563  ;;  %v266_v24 = vld [vmem:[#allocation2 + $0x68] sm:$0xff] }
 0x1d3   :  { %458 = vst.msk [vmem:[#allocation2 + $0x18] sm:$0xff] %vm25_vm1, %v441_v28  ;;  %462 = vst.msk [vmem:[#allocation2 + $0x38] sm:$0xff] %vm25_vm1, %v445_v29 }
 0x1d4   :  { %456 = vst.msk [vmem:[#allocation2 + $0x8] sm:$0xff] %vm25_vm1, %v439_v33  ;;  %460 = vst.msk [vmem:[#allocation2 + $0x28] sm:$0xff] %vm25_vm1, %v443_v34  ;;  %v569_v34 = vpop.permute.xlu0 %568 }
 0x1d6   :  { %v771_v38 = vpop.f32.mrb[4].mxu1 }
 0x1d7   :  { %v448_v40 = vadd.f32 %v771_v38, %v263_v35  ;;  %v407_v41 = vpop.f32.mrb[5].mxu1 }
 0x1d8   :  { %v476_v44 = vld [vmem:[#allocation2 + $0x10] sm:$0xff]  ;;  %v446_v47 = vadd.f32 %v407_v41, %v261_v36  ;;  %v772_v48 = vpop.f32.mrb[6].mxu1 }
 0x1d9   :  { %v480_v46 = vld [vmem:[#allocation2 + $0x30] sm:$0xff]  ;;  %v588_v49 = vmul.f32 %v519_v4, %v476_v44  ;;  %v474_v51 = vld [vmem:[#allocation2] sm:$0xff]  ;;  %465 = vst.msk [vmem:[#allocation2 + $0x50] sm:$0xff] %vm25_vm1, %v448_v40  ;;  %v449_v53 = vadd.f32 %v772_v48, %v264_v39  ;;  %v410_v54 = vpop.f32.mrb[7].mxu1 }
 0x1da   :  { %v592_v50 = vmul.f32 %v539_v11, %v480_v46  ;;  %v478_v52 = vld [vmem:[#allocation2 + $0x20] sm:$0xff]  ;;  %v586_v55 = vmul.f32 %v509_v3, %v474_v51  ;;  %v477_v57 = vld [vmem:[#allocation2 + $0x18] sm:$0xff]  ;;  %463 = vst.msk [vmem:[#allocation2 + $0x40] sm:$0xff] %vm25_vm1, %v446_v47  ;;  %v447_v59 = vadd.f32 %v410_v54, %v262_v42  ;;  %v574_v42 = vpop.permute.xlu1 %573  ;;  %v579_v51 = vpop.permute.xlu0 %578 }
 0x1db   :  { %v590_v56 = vmul.f32 %v529_v7, %v478_v52  ;;  %v481_v58 = vld [vmem:[#allocation2 + $0x38] sm:$0xff]  ;;  %v611_v60 = vadd.f32 %v1013_v45, %v588_v49  ;;  %v589_v62 = vmul.f32 %v994_v6, %v477_v57  ;;  %v475_v0 = vld [vmem:[#allocation2 + $0x8] sm:$0xff]  ;;  %466 = vst.msk [vmem:[#allocation2 + $0x58] sm:$0xff] %vm25_vm1, %v449_v53 }
 0x1dc   :  { %v615_v61 = vadd.f32 %v1013_v45, %v592_v50  ;;  %v593_v63 = vmul.f32 %v544_v32, %v481_v58  ;;  %v479_v1 = vld [vmem:[#allocation2 + $0x28] sm:$0xff]  ;;  %v609_v3 = vadd.f32 %v1013_v45, %v586_v55  ;;  %v587_v7 = vmul.f32 %v992_v5, %v475_v0  ;;  %464 = vst.msk [vmem:[#allocation2 + $0x48] sm:$0xff] %vm25_vm1, %v447_v59 }
 0x1dd   :  { %v613_v4 = vadd.f32 %v1013_v45, %v590_v56  ;;  %v591_v9 = vmul.f32 %v996_v8, %v479_v1  ;;  %v627_v11 = vmax.f32 %v611_v60, 0.0  ;;  %v612_v6 = vadd.f32 %v1013_v45, %v589_v62 }
 0x1de   :  { %v631_v12 = vmax.f32 %v615_v61, 0.0  ;;  %v616_v13 = vadd.f32 %v1013_v45, %v593_v63  ;;  %v625_v16 = vmax.f32 %v609_v3, 0.0  ;;  %v610_v18 = vadd.f32 %v1013_v45, %v587_v7  ;;  %v775_v5 = vpop.f32.mrb[8].mxu1  ;;  %v584_v55 = vpop.permute.xlu1 %583 }
 0x1df   :  { %v629_v17 = vmax.f32 %v613_v4, 0.0  ;;  %v614_v19 = vadd.f32 %v1013_v45, %v591_v9  ;;  %643 = vst.msk [vmem:[%s1113_s5 + $0x10] sm:$0xff] %vm25_vm1, %v627_v11  ;;  %v628_v8 = vmax.f32 %v612_v6, 0.0  ;;  %v452_v22 = vadd.f32 %v775_v5, %v267_v10  ;;  %v423_v23 = vpop.f32.mrb[9].mxu1 }
 0x1e0   :  { %647 = vst.msk [vmem:[%s1113_s5 + $0x30] sm:$0xff] %vm25_vm1, %v631_v12  ;;  %v632_v21 = vmax.f32 %v616_v13, 0.0  ;;  %641 = vst.msk [vmem:[%s1113_s5] sm:$0xff] %vm25_vm1, %v625_v16  ;;  %v626_v25 = vmax.f32 %v610_v18, 0.0  ;;  %v484_v27 = vld [vmem:[#allocation2 + $0x50] sm:$0xff]  ;;  %v450_v28 = vadd.f32 %v423_v23, %v265_v14  ;;  %v776_v29 = vpop.f32.mrb[10].mxu1 }
 0x1e1   :  { %645 = vst.msk [vmem:[%s1113_s5 + $0x20] sm:$0xff] %vm25_vm1, %v629_v17  ;;  %v630_v26 = vmax.f32 %v614_v19, 0.0  ;;  %644 = vst.msk [vmem:[%s1113_s5 + $0x18] sm:$0xff] %vm25_vm1, %v628_v8  ;;  %v596_v30 = vmul.f32 %v559_v2, %v484_v27  ;;  %v482_v31 = vld [vmem:[#allocation2 + $0x40] sm:$0xff]  ;;  %v453_v32 = vadd.f32 %v776_v29, %v268_v20  ;;  %v426_v33 = vpop.f32.mrb[11].mxu1 }
 0x1e2   :  { %648 = vst.msk [vmem:[%s1113_s5 + $0x38] sm:$0xff] %vm25_vm1, %v632_v21  ;;  %469 = vst.msk [vmem:[#allocation2 + $0x70] sm:$0xff] %vm25_vm1, %v452_v22  ;;  %v594_v35 = vmul.f32 %v1006_v37, %v482_v31  ;;  %v485_v36 = vld [vmem:[#allocation2 + $0x58] sm:$0xff]  ;;  %v451_v38 = vadd.f32 %v426_v33, %v266_v24 }
 0x1e3   :  { %642 = vst.msk [vmem:[%s1113_s5 + $0x8] sm:$0xff] %vm25_vm1, %v626_v25  ;;  %646 = vst.msk [vmem:[%s1113_s5 + $0x28] sm:$0xff] %vm25_vm1, %v630_v26  ;;  %v619_v39 = vadd.f32 %v1013_v45, %v596_v30  ;;  %v597_v40 = vmul.f32 %v564_v15, %v485_v36  ;;  %v483_v41 = vld [vmem:[#allocation2 + $0x48] sm:$0xff] }
 0x1e4   :  { %467 = vst.msk [vmem:[#allocation2 + $0x60] sm:$0xff] %vm25_vm1, %v450_v28  ;;  %470 = vst.msk [vmem:[#allocation2 + $0x78] sm:$0xff] %vm25_vm1, %v453_v32  ;;  %v617_v44 = vadd.f32 %v1013_v45, %v594_v35  ;;  %v595_v46 = vmul.f32 %v1008_v43, %v483_v41 }
 0x1e5   :  { %468 = vst.msk [vmem:[#allocation2 + $0x68] sm:$0xff] %vm25_vm1, %v451_v38  ;;  %v635_v47 = vmax.f32 %v619_v39, 0.0  ;;  %v620_v37 = vadd.f32 %v1013_v45, %v597_v40 }
 0x1e6   :  { %v633_v48 = vmax.f32 %v617_v44, 0.0  ;;  %v618_v49 = vadd.f32 %v1013_v45, %v595_v46 }
 0x1e7   :  { %651 = vst.msk [vmem:[%s1113_s5 + $0x50] sm:$0xff] %vm25_vm1, %v635_v47  ;;  %v636_v50 = vmax.f32 %v620_v37, 0.0 }
 0x1e8   :  { %649 = vst.msk [vmem:[%s1113_s5 + $0x40] sm:$0xff] %vm25_vm1, %v633_v48  ;;  %v634_v43 = vmax.f32 %v618_v49, 0.0 }
 0x1e9   :  { %v488_v52 = vld [vmem:[#allocation2 + $0x70] sm:$0xff]  ;;  %652 = vst.msk [vmem:[%s1113_s5 + $0x58] sm:$0xff] %vm25_vm1, %v636_v50 }
 0x1ea   :  { %v600_v53 = vmul.f32 %v579_v51, %v488_v52  ;;  %650 = vst.msk [vmem:[%s1113_s5 + $0x48] sm:$0xff] %vm25_vm1, %v634_v43 }
 0x1eb   :  { %v486_v54 = vld [vmem:[#allocation2 + $0x60] sm:$0xff]  ;;  %v489_v57 = vld [vmem:[#allocation2 + $0x78] sm:$0xff] }
 0x1ec   :  { %v598_v56 = vmul.f32 %v569_v34, %v486_v54  ;;  %v623_v58 = vadd.f32 %v1013_v45, %v600_v53  ;;  %v601_v59 = vmul.f32 %v584_v55, %v489_v57  ;;  %v487_v60 = vld [vmem:[#allocation2 + $0x68] sm:$0xff] }
 0x1ed   :  { %v599_v62 = vmul.f32 %v574_v42, %v487_v60 }
 0x1ee   :  { %v621_v61 = vadd.f32 %v1013_v45, %v598_v56  ;;  %v639_v63 = vmax.f32 %v623_v58, 0.0  ;;  %v624_v0 = vadd.f32 %v1013_v45, %v601_v59 }
 0x1ef   :  { %v622_v2 = vadd.f32 %v1013_v45, %v599_v62 }
 0x1f0   :  { %v637_v1 = vmax.f32 %v621_v61, 0.0  ;;  %655 = vst.msk [vmem:[%s1113_s5 + $0x70] sm:$0xff] %vm25_vm1, %v639_v63  ;;  %v640_v3 = vmax.f32 %v624_v0, 0.0 }
 0x1f1   :  { %v638_v4 = vmax.f32 %v622_v2, 0.0 }
 0x1f2   :  { %653 = vst.msk [vmem:[%s1113_s5 + $0x60] sm:$0xff] %vm25_vm1, %v637_v1  ;;  %656 = vst.msk [vmem:[%s1113_s5 + $0x78] sm:$0xff] %vm25_vm1, %v640_v3 }
 0x1f3   :  { %654 = vst.msk [vmem:[%s1113_s5 + $0x68] sm:$0xff] %vm25_vm1, %v638_v4 }

// kernel: gcn_forward.3
= control target key start
LH: loop header
LB: loop body
LE: loop exit
PB: predicated region body
PF: predicated region fallthrough
CT: control target
= control target key end

     0   :  { %vm42_vm0 = vcmask 261120   ;;  %s1425_s0 = inlined_call_operand.vmem [shape: f32[128,32], index: 0, kind: input, shape index: {}]   ;;  %s1426_s1 = inlined_call_operand.vmem [shape: bf16[128,128], index: 1, kind: input, shape index: {}]   ;;  %s1427_s2 = inlined_call_operand.vmem [shape: f32[128,1], index: 2, kind: input, shape index: {}]   ;;  %s1428_s3 = inlined_call_operand.vmem [shape: f32[1,32], index: 3, kind: input, shape index: {}]   ;;  %s1429_s4 = inlined_call_operand.vmem [shape: f32[32,32], index: 4, kind: input, shape index: {}]   ;;  %s1430_s5 = inlined_call_operand.vmem [shape: f32[2,128], index: 5, kind: input, shape index: {}]   ;;  %s1431_s6 = inlined_call_operand.vmem [shape: f32[32,128], index: 6, kind: input, shape index: {}]   ;;  %s1432_s7 = inlined_call_operand.vmem [shape: f32[1,128], index: 7, kind: input, shape index: {}]   ;;  %s1433_s8 = inlined_call_operand.hbm [shape: f32[2,128], index: 8, kind: output, shape index: {}]  }
   0x1   :  { %v75_v0 = vld [vmem:[%s1429_s4] sm:$0xff]  ;;  %v76_v1 = vld [vmem:[%s1429_s4 + $0x8] sm:$0xff]  ;;  %v77_v2 = vld [vmem:[%s1429_s4 + $0x10] sm:$0xff] }
   0x2   :  { %v1029_v3 = vpack.c.bf16 %v76_v1, %v75_v0  ;;  %v78_v4 = vld [vmem:[%s1429_s4 + $0x18] sm:$0xff]  ;;  %v59_v5 = vld [vmem:[%s1425_s0] sm:$0xff]  ;;  %v60_v7 = vld [vmem:[%s1425_s0 + $0x8] sm:$0xff] }
   0x3   :  { %v1033_v6 = vpack.c.bf16 %v78_v4, %v77_v2  ;;  %927 = vmatprep.mubr.msk.f32.mxu0 %vm42_vm0, %v59_v5  ;;  %v61_v8 = vld [vmem:[%s1425_s0 + $0x10] sm:$0xff]  ;;  %v62_v9 = vld [vmem:[%s1425_s0 + $0x18] sm:$0xff] }
   0x4   :  { %1030 = vmatprep.subr.bf16.mxu0 %v1029_v3 }
   0x5   :  { %1032 = vmatpush3.bf16.msra.mxu0 %v1029_v3 }
   0x6   :  { %1034 = vmatprep.subr.bf16.mxu0 %v1033_v6 }
   0x9   :  { %1036 = vmatpush3.bf16.msra.mxu0 %v1033_v6 }
   0xc   :  { %928 = vmatmul.mubr.msk.f32.vlgmr.msra.gmra.mrb[0].mxu0 %vm42_vm0, %v60_v7 }
   0xd   :  { %930 = vmatprep.mubr.msk.f32.mxu0 %vm42_vm0, %v61_v8 }
   0xe   :  { %13 = vsyncpa [#allocation5], 0  ;;  %v63_v10 = vld [vmem:[%s1425_s0 + $0x20] sm:$0xff]  ;;  %v64_v11 = vld [vmem:[%s1425_s0 + $0x28] sm:$0xff]  ;;  %v1110_v25 = vmov 0   ;;  %v1111_v34 = vmov 0.0  }
   0xf   :  { %v65_v12 = vld [vmem:[%s1425_s0 + $0x30] sm:$0xff]  ;;  %v66_v13 = vld [vmem:[%s1425_s0 + $0x38] sm:$0xff]  ;;  %v67_v14 = vld [vmem:[%s1425_s0 + $0x40] sm:$0xff]  ;;  %1072 = vset.pattern.permute.xlu0 %v1110_v25  ;;  %1073 = vset.pattern.permute.xlu1 %v1110_v25  ;;  %45 = vst.msk [vmem:[#allocation2 + $0x10] sm:$0xff] %vm42_vm0, %v1111_v34  ;;  %v1112_v8 = vmov 0.0|0.0   ;;  %vm1113_vm1 = vmmov 0  }
  0x10   :  { %931 = vmatmul.mubr.msk.f32.gmra.mrb[2].mxu0 %vm42_vm0, %v62_v9  ;;  %v68_v15 = vld [vmem:[%s1425_s0 + $0x48] sm:$0xff]  ;;  %v69_v16 = vld [vmem:[%s1425_s0 + $0x50] sm:$0xff]  ;;  %v70_v17 = vld [vmem:[%s1425_s0 + $0x58] sm:$0xff]  ;;  %43 = vst.msk [vmem:[#allocation2] sm:$0xff] %vm42_vm0, %v1111_v34  ;;  %1037 = vmatprep.subr.bf16.mxu0 %v1112_v8  ;;  %vm37_vm2 = vcmask 254976   ;;  %vm806_vm3 = vcmask 1041408  }
  0x11   :  { %933 = vmatprep.mubr.msk.f32.mxu0 %vm42_vm0, %v63_v10  ;;  %v71_v18 = vld [vmem:[%s1425_s0 + $0x60] sm:$0xff]  ;;  %v72_v19 = vld [vmem:[%s1425_s0 + $0x68] sm:$0xff]  ;;  %v73_v20 = vld [vmem:[%s1425_s0 + $0x70] sm:$0xff]  ;;  %44 = vst.msk [vmem:[#allocation2 + $0x8] sm:$0xff] %vm42_vm0, %v1111_v34 }
  0x12   :  { %v74_v21 = vld [vmem:[%s1425_s0 + $0x78] sm:$0xff]  ;;  %v1074_v22 = vld [vmem:[%s1426_s1] sm:$0xff]   ;;  %v511_v24 = vld [vmem:[%s1427_s2 + $0x10] sm:$0xff]  ;;  %46 = vst.msk [vmem:[#allocation2 + $0x18] sm:$0xff] %vm42_vm0, %v1111_v34 }
  0x13   :  { %967 = vmatprep.mubr.bf16.mxu1 %v1074_v22  ;;  %v509_v23 = vld [vmem:[%s1427_s2] sm:$0xff]  ;;  %537 = vperm.xlu1 %1073, %v511_v24   ;;  %v510_v26 = vld [vmem:[%s1427_s2 + $0x8] sm:$0xff]  ;;  %v512_v27 = vld [vmem:[%s1427_s2 + $0x18] sm:$0xff]  ;;  %47 = vst.msk [vmem:[#allocation2 + $0x20] sm:$0xff] %vm42_vm0, %v1111_v34 }
  0x14   :  { %934 = vmatmul.mubr.msk.f32.gmra.mrb[4].mxu0 %vm42_vm0, %v64_v11  ;;  %527 = vperm.xlu0 %1072, %v509_v23   ;;  %v513_v28 = vld [vmem:[%s1427_s2 + $0x20] sm:$0xff]  ;;  %v514_v29 = vld [vmem:[%s1427_s2 + $0x28] sm:$0xff]  ;;  %v515_v30 = vld [vmem:[%s1427_s2 + $0x30] sm:$0xff]  ;;  %48 = vst.msk [vmem:[#allocation2 + $0x28] sm:$0xff] %vm42_vm0, %v1111_v34 }
  0x15   :  { %936 = vmatprep.mubr.msk.f32.mxu0 %vm42_vm0, %v65_v12  ;;  %v516_v31 = vld [vmem:[%s1427_s2 + $0x38] sm:$0xff]  ;;  %v517_v32 = vld [vmem:[%s1427_s2 + $0x40] sm:$0xff]  ;;  %v518_v33 = vld [vmem:[%s1427_s2 + $0x48] sm:$0xff]  ;;  %49 = vst.msk [vmem:[#allocation2 + $0x30] sm:$0xff] %vm42_vm0, %v1111_v34 }
  0x16   :  { %50 = vst.msk [vmem:[#allocation2 + $0x38] sm:$0xff] %vm42_vm0, %v1111_v34  ;;  %51 = vst.msk [vmem:[#allocation2 + $0x40] sm:$0xff] %vm42_vm0, %v1111_v34  ;;  %v519_v35 = vld [vmem:[%s1427_s2 + $0x50] sm:$0xff]  ;;  %v520_v36 = vld [vmem:[%s1427_s2 + $0x58] sm:$0xff] }
  0x17   :  { %542 = vperm.xlu1 %1073, %v512_v27   ;;  %52 = vst.msk [vmem:[#allocation2 + $0x48] sm:$0xff] %vm42_vm0, %v1111_v34  ;;  %53 = vst.msk [vmem:[#allocation2 + $0x50] sm:$0xff] %vm42_vm0, %v1111_v34  ;;  %v521_v37 = vld [vmem:[%s1427_s2 + $0x60] sm:$0xff]  ;;  %v522_v38 = vld [vmem:[%s1427_s2 + $0x68] sm:$0xff] }
  0x18   :  { %937 = vmatmul.mubr.msk.f32.gmra.mrb[6].mxu0 %vm42_vm0, %v66_v13  ;;  %532 = vperm.xlu0 %1072, %v510_v26   ;;  %54 = vst.msk [vmem:[#allocation2 + $0x58] sm:$0xff] %vm42_vm0, %v1111_v34  ;;  %55 = vst.msk [vmem:[#allocation2 + $0x60] sm:$0xff] %vm42_vm0, %v1111_v34  ;;  %v523_v39 = vld [vmem:[%s1427_s2 + $0x70] sm:$0xff]  ;;  %v524_v40 = vld [vmem:[%s1427_s2 + $0x78] sm:$0xff] }
  0x19   :  { %939 = vmatprep.mubr.msk.f32.mxu0 %vm42_vm0, %v67_v14  ;;  %56 = vst.msk [vmem:[#allocation2 + $0x68] sm:$0xff] %vm42_vm0, %v1111_v34  ;;  %57 = vst.msk [vmem:[#allocation2 + $0x70] sm:$0xff] %vm42_vm0, %v1111_v34  ;;  %v1075_v1 = vld [vmem:[%s1426_s1 + $0x8] sm:$0xff]   ;;  %v1076_v2 = vld [vmem:[%s1426_s1 + $0x10] sm:$0xff]  }
  0x1a   :  { %58 = vst.msk [vmem:[#allocation2 + $0x78] sm:$0xff] %vm42_vm0, %v1111_v34  ;;  %v1077_v3 = vld [vmem:[%s1426_s1 + $0x18] sm:$0xff]   ;;  %v1078_v4 = vld [vmem:[%s1426_s1 + $0x20] sm:$0xff]   ;;  %v1079_v5 = vld [vmem:[%s1426_s1 + $0x28] sm:$0xff]  }
  0x1b   :  { %552 = vperm.xlu1 %1073, %v514_v29   ;;  %v1080_v6 = vld [vmem:[%s1426_s1 + $0x30] sm:$0xff]   ;;  %v1081_v7 = vld [vmem:[%s1426_s1 + $0x38] sm:$0xff]   ;;  %38 = vst.msk [vmem:[#allocation3] sm:$0x3] %vm37_vm2, %v1111_v34  ;;  %v273_v12 = vld [vmem:[#allocation2] sm:$0xff] }
  0x1c   :  { %940 = vmatmul.mubr.msk.f32.gmra.mrb[8].mxu0 %vm42_vm0, %v68_v15  ;;  %547 = vperm.xlu0 %1072, %v513_v28   ;;  %v275_v11 = vld [vmem:[#allocation2 + $0x10] sm:$0xff]  ;;  %v276_v14 = vld [vmem:[#allocation2 + $0x18] sm:$0xff]  ;;  %v277_v27 = vld [vmem:[#allocation2 + $0x20] sm:$0xff] }
  0x1d   :  { %942 = vmatprep.mubr.msk.f32.mxu0 %vm42_vm0, %v69_v16  ;;  %v279_v25 = vld [vmem:[#allocation2 + $0x30] sm:$0xff]  ;;  %v280_v29 = vld [vmem:[#allocation2 + $0x38] sm:$0xff] }
  0x1f   :  { %562 = vperm.xlu1 %1073, %v516_v31  }
  0x20   :  { %943 = vmatmul.mubr.msk.f32.gmra.mrb[10].mxu0 %vm42_vm0, %v70_v17  ;;  %557 = vperm.xlu0 %1072, %v515_v30  }
  0x21   :  { %945 = vmatprep.mubr.msk.f32.mxu0 %vm42_vm0, %v71_v18  ;;  %v274_v18 = vld [vmem:[#allocation2 + $0x8] sm:$0xff] }
  0x23   :  { %572 = vperm.xlu1 %1073, %v518_v33   ;;  %v278_v33 = vld [vmem:[#allocation2 + $0x28] sm:$0xff] }
  0x24   :  { %946 = vmatmul.mubr.msk.f32.gmra.mrb[12].mxu0 %vm42_vm0, %v72_v19  ;;  %567 = vperm.xlu0 %1072, %v517_v32  }
  0x25   :  { %948 = vmatprep.mubr.msk.f32.mxu0 %vm42_vm0, %v73_v20 }
  0x27   :  { %582 = vperm.xlu1 %1073, %v520_v36  }
  0x28   :  { %949 = vmatmul.mubr.msk.f32.gmra.mrb[14].mxu0 %vm42_vm0, %v74_v21  ;;  %577 = vperm.xlu0 %1072, %v519_v35  }
  0x29   :  { %1015 = vmatprep.mubr.msk.f32.mxu0 %vm1113_vm1, %v1111_v34 }
  0x2b   :  { %592 = vperm.xlu1 %1073, %v522_v38  }
  0x2c   :  { %587 = vperm.xlu0 %1072, %v521_v37  }
  0x2f   :  { %602 = vperm.xlu1 %1073, %v524_v40  }
  0x30   :  { %597 = vperm.xlu0 %1072, %v523_v39  }
  0x92   :  { %v538_v9 = vpop.permute.xlu1 %537 }
  0x93   :  { %v528_v10 = vpop.permute.xlu0 %527 }
  0x96   :  { %v543_v15 = vpop.permute.xlu1 %542 }
  0x97   :  { %v533_v21 = vpop.permute.xlu0 %532 }
  0x9a   :  { %v553_v26 = vpop.permute.xlu1 %552 }
  0x9b   :  { %v548_v30 = vpop.permute.xlu0 %547 }
  0xdf   :  { %v929_v41 = vpop.f32.mrb[0].mxu0 }
  0xe0   :  { %v194_v42 = vpop.f32.mrb[1].mxu0 }
  0xe1   :  { %v305_v43 = vpack.c.bf16 %v929_v41, %v194_v42 }
  0xe3   :  { %v932_v44 = vpop.f32.mrb[2].mxu0  ;;  %951 = vmatprep.subr.bf16.mxu1 %v305_v43 }
  0xe4   :  { %v204_v45 = vpop.f32.mrb[3].mxu0  ;;  %952 = vmatpush3.bf16.msra.mxu1 %v305_v43  ;;  %v563_v43 = vpop.permute.xlu1 %562 }
  0xe5   :  { %v306_v46 = vpack.c.bf16 %v932_v44, %v204_v45  ;;  %v1355_v45 = vld [vmem:[%s1428_s3] ss:$0 sm:$0xff] }
  0xe7   :  { %v935_v47 = vpop.f32.mrb[4].mxu0  ;;  %953 = vmatprep.subr.bf16.mxu1 %v306_v46 }
  0xe8   :  { %v214_v48 = vpop.f32.mrb[5].mxu0  ;;  %954 = vmatpush3.bf16.msra.mxu1 %v306_v46 }
  0xe9   :  { %v307_v49 = vpack.c.bf16 %v935_v47, %v214_v48  ;;  %v283_v47 = vld [vmem:[#allocation2 + $0x50] sm:$0xff] }
  0xeb   :  { %v938_v50 = vpop.f32.mrb[6].mxu0  ;;  %955 = vmatprep.subr.bf16.mxu1 %v307_v49 }
  0xec   :  { %v224_v51 = vpop.f32.mrb[7].mxu0  ;;  %956 = vmatpush3.bf16.msra.mxu1 %v307_v49 }
  0xed   :  { %v308_v52 = vpack.c.bf16 %v938_v50, %v224_v51  ;;  %v558_v50 = vpop.permute.xlu0 %557  ;;  %v281_v51 = vld [vmem:[#allocation2 + $0x40] sm:$0xff] }
  0xef   :  { %v941_v53 = vpop.f32.mrb[8].mxu0  ;;  %957 = vmatprep.subr.bf16.mxu1 %v308_v52 }
  0xf0   :  { %v234_v54 = vpop.f32.mrb[9].mxu0  ;;  %958 = vmatpush3.bf16.msra.mxu1 %v308_v52 }
  0xf1   :  { %v309_v55 = vpack.c.bf16 %v941_v53, %v234_v54  ;;  %v284_v53 = vld [vmem:[#allocation2 + $0x58] sm:$0xff] }
  0xf3   :  { %v944_v56 = vpop.f32.mrb[10].mxu0  ;;  %959 = vmatprep.subr.bf16.mxu1 %v309_v55 }
  0xf4   :  { %v244_v57 = vpop.f32.mrb[11].mxu0  ;;  %960 = vmatpush3.bf16.msra.mxu1 %v309_v55 }
  0xf5   :  { %v310_v58 = vpack.c.bf16 %v944_v56, %v244_v57 }
  0xf7   :  { %v947_v59 = vpop.f32.mrb[12].mxu0  ;;  %961 = vmatprep.subr.bf16.mxu1 %v310_v58 }
  0xf8   :  { %v254_v60 = vpop.f32.mrb[13].mxu0  ;;  %962 = vmatpush3.bf16.msra.mxu1 %v310_v58 }
  0xf9   :  { %v311_v61 = vpack.c.bf16 %v947_v59, %v254_v60  ;;  %v282_v59 = vld [vmem:[#allocation2 + $0x48] sm:$0xff] }
  0xfb   :  { %v950_v62 = vpop.f32.mrb[14].mxu0  ;;  %963 = vmatprep.subr.bf16.mxu1 %v311_v61 }
  0xfc   :  { %v264_v63 = vpop.f32.mrb[15].mxu0  ;;  %964 = vmatpush3.bf16.msra.mxu1 %v311_v61 }
  0xfd   :  { %v312_v0 = vpack.c.bf16 %v950_v62, %v264_v63 }
  0xff   :  { %965 = vmatprep.subr.bf16.mxu1 %v312_v0 }
 0x100   :  { %966 = vmatpush3.bf16.msra.mxu1 %v312_v0  ;;  %v573_v0 = vpop.permute.xlu1 %572 }
 0x103   :  { %968 = vmatmul.mubr.bf16.vlgmr.msra.gmra.mrb[0].mxu1 %v1075_v1 }
 0x104   :  { %971 = vmatprep.mubr.bf16.mxu1 %v1076_v2 }
 0x10b   :  { %972 = vmatmul.mubr.bf16.gmra.mrb[4].mxu1 %v1077_v3 }
 0x10c   :  { %975 = vmatprep.mubr.bf16.mxu1 %v1078_v4 }
 0x113   :  { %976 = vmatmul.mubr.bf16.gmra.mrb[8].mxu1 %v1079_v5 }
 0x114   :  { %979 = vmatprep.mubr.bf16.mxu1 %v1080_v6 }
 0x11b   :  { %980 = vmatmul.mubr.bf16.gmra.mrb[12].mxu1 %v1081_v7 }
 0x1d6   :  { %v969_v13 = vpop.f32.mrb[0].mxu1 }
 0x1d7   :  { %v460_v16 = vadd.f32 %v969_v13, %v275_v11  ;;  %v395_v17 = vpop.f32.mrb[1].mxu1 }
 0x1d8   :  { %v458_v19 = vadd.f32 %v395_v17, %v273_v12  ;;  %v970_v20 = vpop.f32.mrb[2].mxu1  ;;  %v287_v12 = vld [vmem:[#allocation2 + $0x70] sm:$0xff] }
 0x1d9   :  { %476 = vst.msk [vmem:[#allocation2 + $0x10] sm:$0xff] %vm42_vm0, %v460_v16  ;;  %v461_v22 = vadd.f32 %v970_v20, %v276_v14  ;;  %v398_v23 = vpop.f32.mrb[3].mxu1  ;;  %v285_v16 = vld [vmem:[#allocation2 + $0x60] sm:$0xff] }
 0x1da   :  { %474 = vst.msk [vmem:[#allocation2] sm:$0xff] %vm42_vm0, %v458_v19  ;;  %v459_v24 = vadd.f32 %v398_v23, %v274_v18  ;;  %v288_v18 = vld [vmem:[#allocation2 + $0x78] sm:$0xff] }
 0x1db   :  { %477 = vst.msk [vmem:[#allocation2 + $0x18] sm:$0xff] %vm42_vm0, %v461_v22  ;;  %v583_v22 = vpop.permute.xlu1 %582 }
 0x1dc   :  { %475 = vst.msk [vmem:[#allocation2 + $0x8] sm:$0xff] %vm42_vm0, %v459_v24 }
 0x1de   :  { %v973_v28 = vpop.f32.mrb[4].mxu1 }
 0x1df   :  { %v464_v31 = vadd.f32 %v973_v28, %v279_v25  ;;  %v411_v32 = vpop.f32.mrb[5].mxu1  ;;  %v286_v25 = vld [vmem:[#allocation2 + $0x68] sm:$0xff] }
 0x1e0   :  { %v462_v35 = vadd.f32 %v411_v32, %v277_v27  ;;  %v974_v36 = vpop.f32.mrb[6].mxu1  ;;  %v495_v46 = vld [vmem:[#allocation2 + $0x10] sm:$0xff] }
 0x1e1   :  { %480 = vst.msk [vmem:[#allocation2 + $0x30] sm:$0xff] %vm42_vm0, %v464_v31  ;;  %v465_v37 = vadd.f32 %v974_v36, %v280_v29  ;;  %v414_v38 = vpop.f32.mrb[7].mxu1  ;;  %v493_v39 = vld [vmem:[#allocation2] sm:$0xff]  ;;  %v607_v56 = vmul.f32 %v538_v9, %v495_v46  ;;  %v568_v9 = vpop.permute.xlu0 %567 }
 0x1e2   :  { %478 = vst.msk [vmem:[#allocation2 + $0x20] sm:$0xff] %vm42_vm0, %v462_v35  ;;  %v463_v40 = vadd.f32 %v414_v38, %v278_v33  ;;  %v605_v41 = vmul.f32 %v528_v10, %v493_v39  ;;  %v496_v42 = vld [vmem:[#allocation2 + $0x18] sm:$0xff] }
 0x1e3   :  { %481 = vst.msk [vmem:[#allocation2 + $0x38] sm:$0xff] %vm42_vm0, %v465_v37  ;;  %v494_v44 = vld [vmem:[#allocation2 + $0x8] sm:$0xff]  ;;  %v608_v49 = vmul.f32 %v543_v15, %v496_v42  ;;  %v630_v5 = vadd.f32 %v1355_v45, %v607_v56 }
 0x1e4   :  { %479 = vst.msk [vmem:[#allocation2 + $0x28] sm:$0xff] %vm42_vm0, %v463_v40  ;;  %v606_v48 = vmul.f32 %v533_v21, %v494_v44  ;;  %v628_v54 = vadd.f32 %v1355_v45, %v605_v41  ;;  %v593_v44 = vpop.permute.xlu1 %592 }
 0x1e5   :  { %v631_v63 = vadd.f32 %v1355_v45, %v608_v49 }
 0x1e6   :  { %v977_v52 = vpop.f32.mrb[8].mxu1  ;;  %v629_v55 = vadd.f32 %v1355_v45, %v606_v48 }
 0x1e7   :  { %v468_v57 = vadd.f32 %v977_v52, %v283_v47  ;;  %v427_v58 = vpop.f32.mrb[9].mxu1  ;;  %v1041_v13 = vpack.c.bf16 %v631_v63, %v630_v5 }
 0x1e8   :  { %v466_v60 = vadd.f32 %v427_v58, %v281_v51  ;;  %v978_v61 = vpop.f32.mrb[10].mxu1  ;;  %v1038_v62 = vpack.c.bf16 %v629_v55, %v628_v54  ;;  %v499_v11 = vld [vmem:[#allocation2 + $0x30] sm:$0xff]  ;;  %v603_v56 = vpop.permute.xlu1 %602 }
 0x1e9   :  { %484 = vst.msk [vmem:[#allocation2 + $0x50] sm:$0xff] %vm42_vm0, %v468_v57  ;;  %v469_v1 = vadd.f32 %v978_v61, %v284_v53  ;;  %v430_v2 = vpop.f32.mrb[11].mxu1  ;;  %v497_v3 = vld [vmem:[#allocation2 + $0x20] sm:$0xff]  ;;  %v611_v21 = vmul.f32 %v558_v50, %v499_v11  ;;  %v725_v11 = vld [vmem:[%s1431_s6 + $0x18] sm:$0xff] }
 0x1ea   :  { %482 = vst.msk [vmem:[#allocation2 + $0x40] sm:$0xff] %vm42_vm0, %v466_v60  ;;  %v467_v4 = vadd.f32 %v430_v2, %v282_v59  ;;  %1039 = vmatpush3.bf16.msra.mxu0 %v1038_v62  ;;  %v609_v6 = vmul.f32 %v548_v30, %v497_v3  ;;  %v500_v7 = vld [vmem:[#allocation2 + $0x38] sm:$0xff]  ;;  %v578_v30 = vpop.permute.xlu0 %577 }
 0x1eb   :  { %485 = vst.msk [vmem:[#allocation2 + $0x58] sm:$0xff] %vm42_vm0, %v469_v1  ;;  %1040 = vmatprep.subr.bf16.mxu0 %v1112_v8  ;;  %v498_v10 = vld [vmem:[#allocation2 + $0x28] sm:$0xff]  ;;  %v612_v15 = vmul.f32 %v563_v43, %v500_v7  ;;  %v634_v36 = vadd.f32 %v1355_v45, %v611_v21  ;;  %v722_v7 = vld [vmem:[%s1431_s6] sm:$0xff] }
 0x1ec   :  { %483 = vst.msk [vmem:[#allocation2 + $0x48] sm:$0xff] %vm42_vm0, %v467_v4  ;;  %v610_v14 = vmul.f32 %v553_v26, %v498_v10  ;;  %v632_v19 = vadd.f32 %v1355_v45, %v609_v6  ;;  %v645_v6 = vld [vmem:[%s1430_s5] sm:$0x3]  ;;  %v724_v10 = vld [vmem:[%s1431_s6 + $0x10] sm:$0xff] }
 0x1ed   :  { %v635_v26 = vadd.f32 %v1355_v45, %v612_v15 }
 0x1ee   :  { %v981_v17 = vpop.f32.mrb[12].mxu1  ;;  %1042 = vmatpush3.bf16.msra.mxu0 %v1041_v13  ;;  %v633_v20 = vadd.f32 %v1355_v45, %v610_v14  ;;  %v588_v49 = vpop.permute.xlu0 %587 }
 0x1ef   :  { %v472_v23 = vadd.f32 %v981_v17, %v287_v12  ;;  %v443_v24 = vpop.f32.mrb[13].mxu1  ;;  %1043 = vmatprep.subr.bf16.mxu0 %v1112_v8  ;;  %v1047_v41 = vpack.c.bf16 %v635_v26, %v634_v36  ;;  %v1065_v12 = vpack.c.bf16 %v725_v11, %v724_v10  ;;  %v859_v17 = vld [vmem:[%s1432_s7] ss:$0 sm:$0xff] }
 0x1f0   :  { %v470_v27 = vadd.f32 %v443_v24, %v285_v16  ;;  %v982_v28 = vpop.f32.mrb[14].mxu1  ;;  %v1044_v29 = vpack.c.bf16 %v633_v20, %v632_v19  ;;  %v503_v40 = vld [vmem:[#allocation2 + $0x50] sm:$0xff] }
 0x1f1   :  { %488 = vst.msk [vmem:[#allocation2 + $0x70] sm:$0xff] %vm42_vm0, %v472_v23  ;;  %v473_v31 = vadd.f32 %v982_v28, %v288_v18  ;;  %v446_v32 = vpop.f32.mrb[15].mxu1  ;;  %v501_v33 = vld [vmem:[#allocation2 + $0x40] sm:$0xff]  ;;  %v615_v48 = vmul.f32 %v578_v30, %v503_v40 }
 0x1f2   :  { %486 = vst.msk [vmem:[#allocation2 + $0x60] sm:$0xff] %vm42_vm0, %v470_v27  ;;  %v471_v35 = vadd.f32 %v446_v32, %v286_v25  ;;  %1045 = vmatpush3.bf16.msra.mxu0 %v1044_v29  ;;  %v613_v37 = vmul.f32 %v568_v9, %v501_v33  ;;  %v504_v38 = vld [vmem:[#allocation2 + $0x58] sm:$0xff]  ;;  %v598_v62 = vpop.permute.xlu0 %597 }
 0x1f3   :  { %489 = vst.msk [vmem:[#allocation2 + $0x78] sm:$0xff] %vm42_vm0, %v473_v31  ;;  %1046 = vmatprep.subr.bf16.mxu0 %v1112_v8  ;;  %v502_v39 = vld [vmem:[#allocation2 + $0x48] sm:$0xff]  ;;  %v616_v43 = vmul.f32 %v583_v22, %v504_v38  ;;  %v638_v53 = vadd.f32 %v1355_v45, %v615_v48 }
 0x1f4   :  { %487 = vst.msk [vmem:[#allocation2 + $0x68] sm:$0xff] %vm42_vm0, %v471_v35  ;;  %v614_v42 = vmul.f32 %v573_v0, %v502_v39  ;;  %v636_v46 = vadd.f32 %v1355_v45, %v613_v37 }
 0x1f5   :  { %v639_v51 = vadd.f32 %v1355_v45, %v616_v43 }
 0x1f6   :  { %1048 = vmatpush3.bf16.msra.mxu0 %v1047_v41  ;;  %v637_v47 = vadd.f32 %v1355_v45, %v614_v42 }
 0x1f7   :  { %1049 = vmatprep.subr.bf16.mxu0 %v1112_v8  ;;  %v1053_v59 = vpack.c.bf16 %v639_v51, %v638_v53 }
 0x1f8   :  { %v1050_v50 = vpack.c.bf16 %v637_v47, %v636_v46  ;;  %v507_v58 = vld [vmem:[#allocation2 + $0x70] sm:$0xff] }
 0x1f9   :  { %v505_v52 = vld [vmem:[#allocation2 + $0x60] sm:$0xff]  ;;  %v619_v1 = vmul.f32 %v598_v62, %v507_v58 }
 0x1fa   :  { %1051 = vmatpush3.bf16.msra.mxu0 %v1050_v50  ;;  %v617_v54 = vmul.f32 %v588_v49, %v505_v52  ;;  %v508_v55 = vld [vmem:[#allocation2 + $0x78] sm:$0xff] }
 0x1fb   :  { %1052 = vmatprep.subr.bf16.mxu0 %v1112_v8  ;;  %v506_v57 = vld [vmem:[#allocation2 + $0x68] sm:$0xff]  ;;  %v620_v61 = vmul.f32 %v603_v56, %v508_v55  ;;  %v642_v4 = vadd.f32 %v1355_v45, %v619_v1 }
 0x1fc   :  { %v618_v60 = vmul.f32 %v593_v44, %v506_v57  ;;  %v640_v63 = vadd.f32 %v1355_v45, %v617_v54 }
 0x1fd   :  { %v643_v3 = vadd.f32 %v1355_v45, %v620_v61 }
 0x1fe   :  { %1054 = vmatpush3.bf16.msra.mxu0 %v1053_v59  ;;  %v641_v0 = vadd.f32 %v1355_v45, %v618_v60  ;;  %v723_v45 = vld [vmem:[%s1431_s6 + $0x8] sm:$0xff]  ;;  %s1114_s6 = smov [#allocation4]  }
 0x1ff   :  { %1055 = vmatprep.subr.bf16.mxu0 %v1112_v8  ;;  %v1059_v5 = vpack.c.bf16 %v643_v3, %v642_v4  ;;  %v1062_v9 = vpack.c.bf16 %v723_v45, %v722_v7  ;;  %s826_s2 = sshll.u32 %s1114_s6, 4  ;;  %s827_s2 = int_to_ptr.vmem [resolvable:$true] %s826_s2 }
 0x200   :  { %v1056_v2 = vpack.c.bf16 %v641_v0, %v640_v63  ;;  %s1086_s7 = scalar_lea.vmem %s827_s2, 32  ;;  %p1091_p1 = scmp.lt.s32.totalorder %s827_s2, %s827_s2 }
 0x201   :  { %p1087_p0 = scmp.ne.s32.totalorder %s827_s2, %s1086_s7  ;;  %p1092_p2 = scmp.lt.s32.totalorder %s1086_s7, %s1086_s7 }
 0x202   :  { %1057 = vmatpush3.bf16.msra.mxu0 %v1056_v2 }
 0x203   :  { %1058 = vmatprep.subr.bf16.mxu0 %v1112_v8  ;;  %p1093_p3 = por %p1092_p2, %p1091_p1 }
 0x205   :  { %p1094_p4 = pnand %p1093_p3, %p1087_p0 }
 0x206   :  { %1060 = vmatpush3.bf16.msra.mxu0 %v1059_v5 }
 0x207   :  { %1061 = vmatprep.subr.bf16.mxu0 %v1112_v8 }
 0x209   :  { %1016 = vmatmul.mubr.f32.vlgmr.msra.gmra.mrb[16].mxu0 %v645_v6 }
 0x20a   :  { %1026 = vmatprep.mubr.msk.f32.mxu0 %vm1113_vm1, %v1111_v34  ;;  %1063 = vmatpush3.bf16.msra.mxu0 %v1062_v9  ;;  %v644_v34 = vld [vmem:[#allocation3] sm:$0x3] }
 0x20b   :  { %1064 = vmatprep.subr.bf16.mxu0 %v1112_v8 }
 0x20e   :  { %1066 = vmatpush3.bf16.msra.mxu0 %v1065_v12 }
 0x2dc   :  { %v712_v13 = vpop.f32.mrb[16].mxu0 }
 0x2dd   :  { %v716_v14 = vadd.f32 %v712_v13, %v644_v34  ;;  %v1017_v15 = vpop.f32.mrb[17].mxu0 }
 0x2df   :  { %718 = vst.msk [vmem:[#allocation3] sm:$0x3] %vm37_vm2, %v716_v14 }
 0x2e6   :  { %v721_v16 = vld [vmem:[#allocation3] sm:$0x3] }
 0x2e7   :  { %1027 = vmatmul.mubr.msk.f32.vlgmr.msra.gmra.mrb[18].mxu0 %vm42_vm0, %v721_v16 }
 0x3ba   :  { %v802_v18 = vpop.f32.mrb[18].mxu0 }
 0x3bb   :  { %v803_v19 = vadd.f32 %v859_v17, %v802_v18  ;;  %v1028_v20 = vpop.f32.mrb[19].mxu0 }
 0x3bd   :  { %v807_v21 = vsel %vm806_vm3, %v803_v19, -inf }
 0x3be   :  { %808 = vmax.xlane.f32.xlu0 %v807_v21 }
 0x44b   :  { %v809_v8 = vpop.xlane.xlu0 %808 }
 0x44c   :  { %v810_v22 = vsub.f32 %v803_v19, %v809_v8 }
 0x44e   :  { %v811_v23 = vmul.f32 1.442695, %v810_v22 }
 0x450   :  { %1082 = vpow2.f32 %v811_v23 }
 0x45a   :  { %v1083_v24 = vpop.eup %1082 }
 0x45b   :  { %v813_v25 = vsel %vm806_vm3, %v1083_v24, 0.0 }
 0x45c   :  { %814 = vadd.xlane.f32.xlu1 %v813_v25 }
 0x4e9   :  { %v815_v27 = vpop.xlane.xlu1 %814 }
 0x4ea   :  { %1084 = vlog2.f32 %v815_v27 }
 0x4f4   :  { %v1085_v28 = vpop.eup %1084 }
 0x4f5   :  { %v817_v29 = vmul.f32 0.6931472, %v1085_v28 }
 0x4f7   :  { %v818_v26 = vsub.f32 %v810_v22, %v817_v29 }
 0x4f9   :  { %819 = vst [vmem:[#allocation4] sm:$0x3] %v818_v26 }
 0x4fa   :  { %1097 = shalt.err (!%p1094_p4)
}
 0x4fb   :  { %s1098_s10 = scalar_lea.hbm %s1433_s8, 32 }
 0x4fc   :  { %p1099_p5 = scmp.ne.s32.totalorder %s1433_s8, %s1098_s10  ;;  %p1102_p6 = scmp.lt.u32.totalorder %s1098_s10, %s1433_s8 }
 0x4fe   :  { %p1104_p7 = pnand %p1102_p6, %p1099_p5 }
 0x500   :  { %1107 = shalt.err (!%p1104_p7)
}
 0x501   :  { %829 = dma.vmem_to_hbm [thread:$0]  %s827_s2, 32, %s1433_s8, [#allocation5]  }
 0x502   :  { %1108 = dma.done.wait [#allocation5], 32  }
 0x503   :  { %1109 = vsyncadd [#allocation5], 4294967264 }
 0x504   :  { %833 = vsyncpa [#allocation5], 1 }

</bundles_post_ra>
